<compile_context>
chip_gen: v6e
topology: v6e:2x2x1
jax: 0.10.0
libtpu: 0.0.40
codegen_flags: <defaults>
</compile_context>

<pallas_src>
import functools

import jax
import jax.numpy as jnp
from jax import lax
from jax.experimental import pallas as pl
from jax.experimental.pallas import tpu as pltpu

_LANE = 128       # lane width (last-dim alignment)
_SUBLANE = 8      # sublane    (second-to-last-dim alignment)
_TC_MAX = 64      # max timesteps per grid step (chunk length)
_UNROLL = 8       # bounded unroll of the per-timestep recurrence loop
# Raises v5e's 16 MiB scoped default; fits every generation's physical VMEM.
# For large H (e.g. H_p >= 1024) this should be re-derived from the resident
# weight footprint.
_VMEM_LIMIT_BYTES = 32 * 1024 * 1024


def _round_up(x, m):
    return (x + m - 1) // m * m


def _pad2d(a, rows, cols):
    return jnp.pad(a, ((0, rows - a.shape[0]), (0, cols - a.shape[1])))


# ---------------------------------------------------------------------------
# Fused multi-layer RNN + FC kernel
# ---------------------------------------------------------------------------
def _fused_rnn_fc_kernel(x_ref, wih0_ref, wihr_ref, whh_ref, bias_ref,
                         fcw_ref, fcb_ref, o_ref, h_ref, seq_ref,
                         *, n_layers, pad_s, unroll):
    """One (batch-tile, time-chunk) grid step of the fused multi-layer RNN + FC.

    Grid axes: (batch tile [parallel], time chunk [arbitrary / sequential]).
    h_ref  : (L, bt, H_p) VMEM scratch -- per-layer hidden state carried across chunks.
    seq_ref: (Tc, bt, H_p) VMEM scratch -- per-chunk workspace; for each layer it first
             holds the hoisted input projection (+bias), then is overwritten step by
             step with that layer's hidden outputs (the next layer's input).
    """
    c = pl.program_id(1)                      # time-chunk index (sequential recurrence)

    @pl.when(c == 0)
    def _init():                              # h0 = zeros (detached in the torch code)
        h_ref[...] = jnp.zeros_like(h_ref)

    tc, bt, d0 = x_ref.shape
    h_p = h_ref.shape[-1]

    # Validity of each timestep w.r.t. the front-padded prefix (x rows there are
    # zero; the bias must also be zeroed so h stays exactly 0 until the first
    # real timestep).  pad_s is a static Python int -> lowers to nothing when 0.
    if pad_s > 0:
        t_idx = lax.broadcasted_iota(jnp.int32, (tc, 1, h_p), 0)
        valid = ((c * tc + t_idx) >= pad_s).astype(jnp.float32)     # (tc, 1, h_p)
    else:
        valid = None

    for l in range(n_layers):
        # ---- hoisted lane-dense input projection for the whole chunk (one MXU matmul)
        if l == 0:
            lhs = x_ref[...].reshape(tc * bt, d0).astype(jnp.bfloat16)
            w_ih_t = wih0_ref[...]                                   # (d0, h_p) bf16
        else:
            lhs = seq_ref[...].reshape(tc * bt, h_p).astype(jnp.bfloat16)
            w_ih_t = wihr_ref[l - 1]                                 # (h_p, h_p) bf16
        proj = jnp.dot(lhs, w_ih_t,
                       preferred_element_type=jnp.float32).reshape(tc, bt, h_p)
        bias = bias_ref[l][None]                                     # (1, 1, h_p) f32
        if valid is not None:
            bias = bias * valid
        seq_ref[...] = proj + bias

        # ---- serial recurrence over the chunk: h = tanh(p_t + h @ W_hh^T)
        whh_t = whh_ref[l]                                           # (h_p, h_p) bf16
        write_seq = l < n_layers - 1       # last layer's sequence has no consumer

        def step(t, h):
            h = jnp.tanh(
                seq_ref[t]
                + jnp.dot(h.astype(jnp.bfloat16), whh_t,
                          preferred_element_type=jnp.float32))
            if write_seq:
                seq_ref[t] = h             # becomes the next layer's input
            return h

        h_ref[l] = lax.fori_loop(0, tc, step, h_ref[l],
                                 unroll=min(unroll, tc))

    # ---- fused FC head on the last layer's final hidden state (last chunk only)
    @pl.when(c == pl.num_programs(1) - 1)
    def _head():
        h_last = h_ref[n_layers - 1]
        o_ref[...] = (
            jnp.dot(h_last.astype(jnp.bfloat16), fcw_ref[...],
                    preferred_element_type=jnp.float32)
            + fcb_ref[...]
        ).astype(o_ref.dtype)


# ---------------------------------------------------------------------------
# pallas_call wrapper
# ---------------------------------------------------------------------------
def _fused_forward(x_p, wih0, wihr, whh, bias, fcw, fcb, *,
                   tc, bt, n_layers, pad_s, unroll):
    """x_p: (S_pad, B_p, D0_p) time-major f32; returns (B_p, O_p) f32."""
    s_pad, b_p, d0_p = x_p.shape
    h_p = whh.shape[-1]
    lm1 = wihr.shape[0]
    o_p = fcw.shape[-1]
    assert s_pad % tc == 0 and b_p % bt == 0

    kernel = functools.partial(_fused_rnn_fc_kernel, n_layers=n_layers,
                               pad_s=pad_s, unroll=unroll)
    return pl.pallas_call(
        kernel,
        out_shape=jax.ShapeDtypeStruct((b_p, o_p), jnp.float32),
        grid_spec=pltpu.PrefetchScalarGridSpec(
            num_scalar_prefetch=0,
            grid=(b_p // bt, s_pad // tc),
            in_specs=[
                pl.BlockSpec((tc, bt, d0_p), lambda bi, c: (c, bi, 0)),      # x chunk
                pl.BlockSpec((d0_p, h_p), lambda bi, c: (0, 0)),             # W_ih^T layer0
                pl.BlockSpec((lm1, h_p, h_p), lambda bi, c: (0, 0, 0)),      # W_ih^T layers1+
                pl.BlockSpec((n_layers, h_p, h_p), lambda bi, c: (0, 0, 0)),  # W_hh^T (all)
                pl.BlockSpec((n_layers, 1, h_p), lambda bi, c: (0, 0, 0)),   # summed biases
                pl.BlockSpec((h_p, o_p), lambda bi, c: (0, 0)),              # fc_w^T
                pl.BlockSpec((1, o_p), lambda bi, c: (0, 0)),                # fc_b
            ],
            out_specs=pl.BlockSpec((bt, o_p), lambda bi, c: (bi, 0)),        # resident/tile
            scratch_shapes=[
                pltpu.VMEM((n_layers, bt, h_p), jnp.float32),   # carried hidden per layer
                pltpu.VMEM((tc, bt, h_p), jnp.float32),         # chunk workspace
            ],
        ),
        compiler_params=pltpu.CompilerParams(
            dimension_semantics=("parallel", "arbitrary"),
            vmem_limit_bytes=_VMEM_LIMIT_BYTES,
        ),
    )(x_p, wih0, wihr, whh, bias, fcw, fcb)


# ---------------------------------------------------------------------------
# Model forward (batch-first public interface, like the PyTorch module)
# ---------------------------------------------------------------------------
@jax.jit
def rnn_model_forward(x, params):
    """x: (batch, seq, input_dim) batch-first, exactly like the PyTorch module."""
    b, s, d0 = x.shape
    h_dim = params["rnn"][0][1].shape[0]
    o_dim = params["fc_w"].shape[0]
    n_layers = len(params["rnn"])

    b_p = _round_up(b, _SUBLANE)
    h_p = _round_up(h_dim, _LANE)
    d0_p = _round_up(d0, _LANE)
    o_p = _round_up(o_dim, _LANE)
    tc = min(s, _TC_MAX)
    s_pad = _round_up(s, tc)
    pad_s = s_pad - s                       # always < tc: only chunk 0 has padded steps

    # Batch tile: split across two tiles when big enough so v7x's second
    # TensorCore gets work (the leading grid axis is "parallel"); no-op on v5e/v6e.
    bt = b_p // 2 if (b_p >= 16 and b_p % 16 == 0) else b_p

    # batch-first -> time-major; front-pad time (zeros), pad batch & feature dims.
    a = jnp.transpose(x, (1, 0, 2)).astype(jnp.float32)              # (S, B, D0)
    a = jnp.pad(a, ((pad_s, 0), (0, b_p - b), (0, d0_p - d0)))       # (S_pad, B_p, D0_p)

    # Pre-transposed, zero-padded weights; bf16 operands for the MXU (f32 accumulate
    # in-kernel).  Zero padding is exact in bf16, so padded hidden columns stay 0.
    wih0 = _pad2d(params["rnn"][0][0].T.astype(jnp.float32), d0_p, h_p).astype(jnp.bfloat16)
    if n_layers > 1:
        wihr = jnp.stack([_pad2d(w_ih.T.astype(jnp.float32), h_p, h_p)
                          for (w_ih, _, _, _) in params["rnn"][1:]]).astype(jnp.bfloat16)
    else:
        wihr = jnp.zeros((1, h_p, h_p), jnp.bfloat16)                # unused dummy
    whh = jnp.stack([_pad2d(w_hh.T.astype(jnp.float32), h_p, h_p)
                     for (_, w_hh, _, _) in params["rnn"]]).astype(jnp.bfloat16)
    bias = jnp.stack([jnp.pad((b_ih + b_hh).astype(jnp.float32),
                              (0, h_p - h_dim)).reshape(1, h_p)
                      for (_, _, b_ih, b_hh) in params["rnn"]])       # (L, 1, H_p) f32
    fcw = _pad2d(params["fc_w"].T.astype(jnp.float32), h_p, o_p).astype(jnp.bfloat16)
    fcb = jnp.pad(params["fc_b"].astype(jnp.float32), (0, o_p - o_dim)).reshape(1, o_p)

    out_p = _fused_forward(a, wih0, wihr, whh, bias, fcw, fcb,
                           tc=tc, bt=bt, n_layers=n_layers,
                           pad_s=pad_s, unroll=_UNROLL)
    return out_p[:b, :o_dim]


# ---------------------------------------------------------------------------
# Pure-JAX reference (f32 end-to-end, for validation)
# ---------------------------------------------------------------------------
def reference_forward(x, params):
    B, S, _ = x.shape
    layer_in = x
    for (w_ih, w_hh, b_ih, b_hh) in params["rnn"]:
        H = w_hh.shape[0]
        h = jnp.zeros((B, H), jnp.float32)
        outs = []
        for t in range(S):
            h = jnp.tanh(layer_in[:, t, :] @ w_ih.T + b_ih + h @ w_hh.T + b_hh)
            outs.append(h)
        layer_in = jnp.stack(outs, axis=1)
    last = layer_in[:, -1, :]
    return last @ params["fc_w"].T + params["fc_b"]


# ---------------------------------------------------------------------------
# Deterministic parameter init (PyTorch-style U(-1/sqrt(H), 1/sqrt(H)) shapes)
# ---------------------------------------------------------------------------
def init_params(key, input_dim, hidden_dim, layer_dim, output_dim):
    k = 1.0 / jnp.sqrt(hidden_dim)
    params = {"rnn": []}
    for layer in range(layer_dim):
        d_in = input_dim if layer == 0 else hidden_dim
        key, k1, k2, k3, k4 = jax.random.split(key, 5)
        w_ih = jax.random.uniform(k1, (hidden_dim, d_in), jnp.float32, -k, k)
        w_hh = jax.random.uniform(k2, (hidden_dim, hidden_dim), jnp.float32, -k, k)
        b_ih = jax.random.uniform(k3, (hidden_dim,), jnp.float32, -k, k)
        b_hh = jax.random.uniform(k4, (hidden_dim,), jnp.float32, -k, k)
        params["rnn"].append((w_ih, w_hh, b_ih, b_hh))
    key, k5, k6 = jax.random.split(key, 3)
    params["fc_w"] = jax.random.uniform(k5, (output_dim, hidden_dim), jnp.float32, -k, k)
    params["fc_b"] = jax.random.uniform(k6, (output_dim,), jnp.float32, -k, k)
    return params


if __name__ == "__main__":
    # Small shapes consistent with the module's forward contract.
    batch, seq = 2, 8
    input_dim, hidden_dim, layer_dim, output_dim = 4, 32, 2, 3
    dropout_prob = 0.1  # unused in eval-mode forward

    key = jax.random.PRNGKey(0)
    key, kx = jax.random.split(key)
    params = init_params(key, input_dim, hidden_dim, layer_dim, output_dim)
    x = jax.random.normal(kx, (batch, seq, input_dim), jnp.float32)

    out = rnn_model_forward(x, params)
    out = jax.block_until_ready(out)
    assert out.shape == (batch, output_dim), out.shape

    ref = reference_forward(x, params)
    err = float(jnp.max(jnp.abs(out - ref)))
    # bf16 MXU operands (f32 accumulate) -> loosened tolerance vs. the f32 reference.
    assert jnp.allclose(out, ref, atol=5e-2, rtol=5e-2), (
        f"mismatch vs reference: max abs err {err}"
    )
    print("KERNEL_OK")
</pallas_src>

<mosaic_0001>
module attributes {stable_mosaic.version = 11 : i64} {
  func.func @_fused_rnn_fc_kernel(%arg0: i32, %arg1: i32, %arg2: memref<8x8x128xf32, #tpu.memory_space<vmem>>, %arg3: memref<128x128xbf16, #tpu.memory_space<vmem>>, %arg4: memref<1x128x128xbf16, #tpu.memory_space<vmem>>, %arg5: memref<2x128x128xbf16, #tpu.memory_space<vmem>>, %arg6: memref<2x1x128xf32, #tpu.memory_space<vmem>>, %arg7: memref<128x128xbf16, #tpu.memory_space<vmem>>, %arg8: memref<1x128xf32, #tpu.memory_space<vmem>>, %arg9: memref<8x128xf32, #tpu.memory_space<vmem>>, %arg10: memref<2x8x128xf32, #tpu.memory_space<vmem>>, %arg11: memref<8x8x128xf32, #tpu.memory_space<vmem>>) attributes {dimension_semantics = [#tpu.dimension_semantics<parallel>, #tpu.dimension_semantics<arbitrary>], iteration_bounds = array<i64: 1, 1>, scalar_prefetch = 0 : i64, scratch_operands = 2 : i64, tpu.core_type = #tpu.core_type<tc>, window_params = [{transform_indices = @transform_0, window_bounds = array<i64: 8, 8, 128>}, {pipeline_mode = #tpu.pipeline_mode<synchronous>, transform_indices = @transform_1, window_bounds = array<i64: 128, 128>}, {pipeline_mode = #tpu.pipeline_mode<synchronous>, transform_indices = @transform_2, window_bounds = array<i64: 1, 128, 128>}, {pipeline_mode = #tpu.pipeline_mode<synchronous>, transform_indices = @transform_3, window_bounds = array<i64: 2, 128, 128>}, {pipeline_mode = #tpu.pipeline_mode<synchronous>, transform_indices = @transform_4, window_bounds = array<i64: 2, 1, 128>}, {pipeline_mode = #tpu.pipeline_mode<synchronous>, transform_indices = @transform_5, window_bounds = array<i64: 128, 128>}, {pipeline_mode = #tpu.pipeline_mode<synchronous>, transform_indices = @transform_6, window_bounds = array<i64: 1, 128>}, {transform_indices = @transform_7, window_bounds = array<i64: 8, 128>}]} {
    %c0_i32 = arith.constant 0 : i32
    %0 = arith.cmpi eq, %arg1, %c0_i32 : i32
    %1 = arith.extui %0 : i1 to i32
    %c0_i32_0 = arith.constant 0 : i32
    %2 = arith.cmpi ne, %1, %c0_i32_0 : i32
    scf.if %2 {
      %cst_117 = arith.constant 0.000000e+00 : f32
      %189 = vector.broadcast %cst_117 : f32 to vector<2x8x128xf32>
      %c0_118 = arith.constant 0 : index
      %c0_119 = arith.constant 0 : index
      %c0_120 = arith.constant 0 : index
      %190 = vector.load %arg10[%c0_118, %c0_119, %c0_120] : memref<2x8x128xf32, #tpu.memory_space<vmem>>, vector<2x8x128xf32>
      tpu.vector_store %arg10[%c0_118, %c0_119, %c0_120], %189 {strides = array<i32>} : memref<2x8x128xf32, #tpu.memory_space<vmem>>, vector<2x8x128xf32>,
    } else {
    }
    %c0 = arith.constant 0 : index
    %c0_1 = arith.constant 0 : index
    %c0_2 = arith.constant 0 : index
    %3 = vector.load %arg2[%c0, %c0_1, %c0_2] : memref<8x8x128xf32, #tpu.memory_space<vmem>>, vector<8x8x128xf32>
    %4 = vector.shape_cast %3 : vector<8x8x128xf32> to vector<64x128xf32>
    %5 = arith.truncf %4 : vector<64x128xf32> to vector<64x128xbf16>
    %c0_3 = arith.constant 0 : index
    %c0_4 = arith.constant 0 : index
    %6 = vector.load %arg3[%c0_3, %c0_4] : memref<128x128xbf16, #tpu.memory_space<vmem>>, vector<128x128xbf16>
    %cst = arith.constant dense<0.000000e+00> : vector<64x128xf32>
    %7 = tpu.matmul %5, %6, %cst {dimension_numbers = #tpu.dot_dimension_numbers<[1], [0], [0], [1], [0, 0, 1, 1], [], []>} : vector<64x128xbf16>, vector<128x128xbf16>, vector<64x128xf32> -> vector<64x128xf32>
    %8 = vector.shape_cast %7 : vector<64x128xf32> to vector<8x8x128xf32>
    %c0_5 = arith.constant 0 : index
    %c0_6 = arith.constant 0 : index
    %c0_7 = arith.constant 0 : index
    %9 = vector.load %arg6[%c0_5, %c0_6, %c0_7] : memref<2x1x128xf32, #tpu.memory_space<vmem>>, vector<1x1x128xf32>
    %10 = vector.shape_cast %9 : vector<1x1x128xf32> to vector<1x128xf32>
    %11 = vector.shape_cast %10 : vector<1x128xf32> to vector<1x1x128xf32>
    %12 = vector.broadcast %11 : vector<1x1x128xf32> to vector<8x8x128xf32>
    %13 = arith.addf %8, %12 : vector<8x8x128xf32>
    %c0_8 = arith.constant 0 : index
    %c0_9 = arith.constant 0 : index
    %c0_10 = arith.constant 0 : index
    %14 = vector.load %arg11[%c0_8, %c0_9, %c0_10] : memref<8x8x128xf32, #tpu.memory_space<vmem>>, vector<8x8x128xf32>
    tpu.vector_store %arg11[%c0_8, %c0_9, %c0_10], %13 {strides = array<i32>} : memref<8x8x128xf32, #tpu.memory_space<vmem>>, vector<8x8x128xf32>,
    %c0_11 = arith.constant 0 : index
    %c0_12 = arith.constant 0 : index
    %c0_13 = arith.constant 0 : index
    %15 = vector.load %arg5[%c0_11, %c0_12, %c0_13] : memref<2x128x128xbf16, #tpu.memory_space<vmem>>, vector<1x128x128xbf16>
    %16 = vector.shape_cast %15 : vector<1x128x128xbf16> to vector<128x128xbf16>
    %c0_14 = arith.constant 0 : index
    %c0_15 = arith.constant 0 : index
    %c0_16 = arith.constant 0 : index
    %17 = vector.load %arg10[%c0_14, %c0_15, %c0_16] : memref<2x8x128xf32, #tpu.memory_space<vmem>>, vector<1x8x128xf32>
    %18 = vector.shape_cast %17 : vector<1x8x128xf32> to vector<8x128xf32>
    %c0_i32_17 = arith.constant 0 : i32
    %19 = arith.index_cast %c0_i32_17 : i32 to index
    %c0_18 = arith.constant 0 : index
    %c0_19 = arith.constant 0 : index
    %20 = vector.load %arg11[%19, %c0_18, %c0_19] : memref<8x8x128xf32, #tpu.memory_space<vmem>>, vector<1x8x128xf32>
    %21 = vector.shape_cast %20 : vector<1x8x128xf32> to vector<8x128xf32>
    %22 = arith.truncf %18 : vector<8x128xf32> to vector<8x128xbf16>
    %cst_20 = arith.constant dense<0.000000e+00> : vector<8x128xf32>
    %23 = tpu.matmul %22, %16, %cst_20 {dimension_numbers = #tpu.dot_dimension_numbers<[1], [0], [0], [1], [0, 0, 1, 1], [], []>} : vector<8x128xbf16>, vector<128x128xbf16>, vector<8x128xf32> -> vector<8x128xf32>
    %24 = arith.addf %21, %23 : vector<8x128xf32>
    %25 = math.tanh %24 : vector<8x128xf32>
    %26 = arith.index_cast %c0_i32_17 : i32 to index
    %c0_21 = arith.constant 0 : index
    %c0_22 = arith.constant 0 : index
    %27 = vector.load %arg11[%26, %c0_21, %c0_22] : memref<8x8x128xf32, #tpu.memory_space<vmem>>, vector<1x8x128xf32>
    %28 = vector.shape_cast %27 : vector<1x8x128xf32> to vector<8x128xf32>
    %29 = vector.shape_cast %25 : vector<8x128xf32> to vector<1x8x128xf32>
    tpu.vector_store %arg11[%26, %c0_21, %c0_22], %29 {strides = array<i32>} : memref<8x8x128xf32, #tpu.memory_space<vmem>>, vector<1x8x128xf32>,
    %c1_i32 = arith.constant 1 : i32
    %30 = arith.index_cast %c1_i32 : i32 to index
    %c0_23 = arith.constant 0 : index
    %c0_24 = arith.constant 0 : index
    %31 = vector.load %arg11[%30, %c0_23, %c0_24] : memref<8x8x128xf32, #tpu.memory_space<vmem>>, vector<1x8x128xf32>
    %32 = vector.shape_cast %31 : vector<1x8x128xf32> to vector<8x128xf32>
    %33 = arith.truncf %25 : vector<8x128xf32> to vector<8x128xbf16>
    %cst_25 = arith.constant dense<0.000000e+00> : vector<8x128xf32>
    %34 = tpu.matmul %33, %16, %cst_25 {dimension_numbers = #tpu.dot_dimension_numbers<[1], [0], [0], [1], [0, 0, 1, 1], [], []>} : vector<8x128xbf16>, vector<128x128xbf16>, vector<8x128xf32> -> vector<8x128xf32>
    %35 = arith.addf %32, %34 : vector<8x128xf32>
    %36 = math.tanh %35 : vector<8x128xf32>
    %37 = arith.index_cast %c1_i32 : i32 to index
    %c0_26 = arith.constant 0 : index
    %c0_27 = arith.constant 0 : index
    %38 = vector.load %arg11[%37, %c0_26, %c0_27] : memref<8x8x128xf32, #tpu.memory_space<vmem>>, vector<1x8x128xf32>
    %39 = vector.shape_cast %38 : vector<1x8x128xf32> to vector<8x128xf32>
    %40 = vector.shape_cast %36 : vector<8x128xf32> to vector<1x8x128xf32>
    tpu.vector_store %arg11[%37, %c0_26, %c0_27], %40 {strides = array<i32>} : memref<8x8x128xf32, #tpu.memory_space<vmem>>, vector<1x8x128xf32>,
    %c2_i32 = arith.constant 2 : i32
    %41 = arith.index_cast %c2_i32 : i32 to index
    %c0_28 = arith.constant 0 : index
    %c0_29 = arith.constant 0 : index
    %42 = vector.load %arg11[%41, %c0_28, %c0_29] : memref<8x8x128xf32, #tpu.memory_space<vmem>>, vector<1x8x128xf32>
    %43 = vector.shape_cast %42 : vector<1x8x128xf32> to vector<8x128xf32>
    %44 = arith.truncf %36 : vector<8x128xf32> to vector<8x128xbf16>
    %cst_30 = arith.constant dense<0.000000e+00> : vector<8x128xf32>
    %45 = tpu.matmul %44, %16, %cst_30 {dimension_numbers = #tpu.dot_dimension_numbers<[1], [0], [0], [1], [0, 0, 1, 1], [], []>} : vector<8x128xbf16>, vector<128x128xbf16>, vector<8x128xf32> -> vector<8x128xf32>
    %46 = arith.addf %43, %45 : vector<8x128xf32>
    %47 = math.tanh %46 : vector<8x128xf32>
    %48 = arith.index_cast %c2_i32 : i32 to index
    %c0_31 = arith.constant 0 : index
    %c0_32 = arith.constant 0 : index
    %49 = vector.load %arg11[%48, %c0_31, %c0_32] : memref<8x8x128xf32, #tpu.memory_space<vmem>>, vector<1x8x128xf32>
    %50 = vector.shape_cast %49 : vector<1x8x128xf32> to vector<8x128xf32>
    %51 = vector.shape_cast %47 : vector<8x128xf32> to vector<1x8x128xf32>
    tpu.vector_store %arg11[%48, %c0_31, %c0_32], %51 {strides = array<i32>} : memref<8x8x128xf32, #tpu.memory_space<vmem>>, vector<1x8x128xf32>,
    %c3_i32 = arith.constant 3 : i32
    %52 = arith.index_cast %c3_i32 : i32 to index
    %c0_33 = arith.constant 0 : index
    %c0_34 = arith.constant 0 : index
    %53 = vector.load %arg11[%52, %c0_33, %c0_34] : memref<8x8x128xf32, #tpu.memory_space<vmem>>, vector<1x8x128xf32>
    %54 = vector.shape_cast %53 : vector<1x8x128xf32> to vector<8x128xf32>
    %55 = arith.truncf %47 : vector<8x128xf32> to vector<8x128xbf16>
    %cst_35 = arith.constant dense<0.000000e+00> : vector<8x128xf32>
    %56 = tpu.matmul %55, %16, %cst_35 {dimension_numbers = #tpu.dot_dimension_numbers<[1], [0], [0], [1], [0, 0, 1, 1], [], []>} : vector<8x128xbf16>, vector<128x128xbf16>, vector<8x128xf32> -> vector<8x128xf32>
    %57 = arith.addf %54, %56 : vector<8x128xf32>
    %58 = math.tanh %57 : vector<8x128xf32>
    %59 = arith.index_cast %c3_i32 : i32 to index
    %c0_36 = arith.constant 0 : index
    %c0_37 = arith.constant 0 : index
    %60 = vector.load %arg11[%59, %c0_36, %c0_37] : memref<8x8x128xf32, #tpu.memory_space<vmem>>, vector<1x8x128xf32>
    %61 = vector.shape_cast %60 : vector<1x8x128xf32> to vector<8x128xf32>
    %62 = vector.shape_cast %58 : vector<8x128xf32> to vector<1x8x128xf32>
    tpu.vector_store %arg11[%59, %c0_36, %c0_37], %62 {strides = array<i32>} : memref<8x8x128xf32, #tpu.memory_space<vmem>>, vector<1x8x128xf32>,
    %c4_i32 = arith.constant 4 : i32
    %63 = arith.index_cast %c4_i32 : i32 to index
    %c0_38 = arith.constant 0 : index
    %c0_39 = arith.constant 0 : index
    %64 = vector.load %arg11[%63, %c0_38, %c0_39] : memref<8x8x128xf32, #tpu.memory_space<vmem>>, vector<1x8x128xf32>
    %65 = vector.shape_cast %64 : vector<1x8x128xf32> to vector<8x128xf32>
    %66 = arith.truncf %58 : vector<8x128xf32> to vector<8x128xbf16>
    %cst_40 = arith.constant dense<0.000000e+00> : vector<8x128xf32>
    %67 = tpu.matmul %66, %16, %cst_40 {dimension_numbers = #tpu.dot_dimension_numbers<[1], [0], [0], [1], [0, 0, 1, 1], [], []>} : vector<8x128xbf16>, vector<128x128xbf16>, vector<8x128xf32> -> vector<8x128xf32>
    %68 = arith.addf %65, %67 : vector<8x128xf32>
    %69 = math.tanh %68 : vector<8x128xf32>
    %70 = arith.index_cast %c4_i32 : i32 to index
    %c0_41 = arith.constant 0 : index
    %c0_42 = arith.constant 0 : index
    %71 = vector.load %arg11[%70, %c0_41, %c0_42] : memref<8x8x128xf32, #tpu.memory_space<vmem>>, vector<1x8x128xf32>
    %72 = vector.shape_cast %71 : vector<1x8x128xf32> to vector<8x128xf32>
    %73 = vector.shape_cast %69 : vector<8x128xf32> to vector<1x8x128xf32>
    tpu.vector_store %arg11[%70, %c0_41, %c0_42], %73 {strides = array<i32>} : memref<8x8x128xf32, #tpu.memory_space<vmem>>, vector<1x8x128xf32>,
    %c5_i32 = arith.constant 5 : i32
    %74 = arith.index_cast %c5_i32 : i32 to index
    %c0_43 = arith.constant 0 : index
    %c0_44 = arith.constant 0 : index
    %75 = vector.load %arg11[%74, %c0_43, %c0_44] : memref<8x8x128xf32, #tpu.memory_space<vmem>>, vector<1x8x128xf32>
    %76 = vector.shape_cast %75 : vector<1x8x128xf32> to vector<8x128xf32>
    %77 = arith.truncf %69 : vector<8x128xf32> to vector<8x128xbf16>
    %cst_45 = arith.constant dense<0.000000e+00> : vector<8x128xf32>
    %78 = tpu.matmul %77, %16, %cst_45 {dimension_numbers = #tpu.dot_dimension_numbers<[1], [0], [0], [1], [0, 0, 1, 1], [], []>} : vector<8x128xbf16>, vector<128x128xbf16>, vector<8x128xf32> -> vector<8x128xf32>
    %79 = arith.addf %76, %78 : vector<8x128xf32>
    %80 = math.tanh %79 : vector<8x128xf32>
    %81 = arith.index_cast %c5_i32 : i32 to index
    %c0_46 = arith.constant 0 : index
    %c0_47 = arith.constant 0 : index
    %82 = vector.load %arg11[%81, %c0_46, %c0_47] : memref<8x8x128xf32, #tpu.memory_space<vmem>>, vector<1x8x128xf32>
    %83 = vector.shape_cast %82 : vector<1x8x128xf32> to vector<8x128xf32>
    %84 = vector.shape_cast %80 : vector<8x128xf32> to vector<1x8x128xf32>
    tpu.vector_store %arg11[%81, %c0_46, %c0_47], %84 {strides = array<i32>} : memref<8x8x128xf32, #tpu.memory_space<vmem>>, vector<1x8x128xf32>,
    %c6_i32 = arith.constant 6 : i32
    %85 = arith.index_cast %c6_i32 : i32 to index
    %c0_48 = arith.constant 0 : index
    %c0_49 = arith.constant 0 : index
    %86 = vector.load %arg11[%85, %c0_48, %c0_49] : memref<8x8x128xf32, #tpu.memory_space<vmem>>, vector<1x8x128xf32>
    %87 = vector.shape_cast %86 : vector<1x8x128xf32> to vector<8x128xf32>
    %88 = arith.truncf %80 : vector<8x128xf32> to vector<8x128xbf16>
    %cst_50 = arith.constant dense<0.000000e+00> : vector<8x128xf32>
    %89 = tpu.matmul %88, %16, %cst_50 {dimension_numbers = #tpu.dot_dimension_numbers<[1], [0], [0], [1], [0, 0, 1, 1], [], []>} : vector<8x128xbf16>, vector<128x128xbf16>, vector<8x128xf32> -> vector<8x128xf32>
    %90 = arith.addf %87, %89 : vector<8x128xf32>
    %91 = math.tanh %90 : vector<8x128xf32>
    %92 = arith.index_cast %c6_i32 : i32 to index
    %c0_51 = arith.constant 0 : index
    %c0_52 = arith.constant 0 : index
    %93 = vector.load %arg11[%92, %c0_51, %c0_52] : memref<8x8x128xf32, #tpu.memory_space<vmem>>, vector<1x8x128xf32>
    %94 = vector.shape_cast %93 : vector<1x8x128xf32> to vector<8x128xf32>
    %95 = vector.shape_cast %91 : vector<8x128xf32> to vector<1x8x128xf32>
    tpu.vector_store %arg11[%92, %c0_51, %c0_52], %95 {strides = array<i32>} : memref<8x8x128xf32, #tpu.memory_space<vmem>>, vector<1x8x128xf32>,
    %c7_i32 = arith.constant 7 : i32
    %96 = arith.index_cast %c7_i32 : i32 to index
    %c0_53 = arith.constant 0 : index
    %c0_54 = arith.constant 0 : index
    %97 = vector.load %arg11[%96, %c0_53, %c0_54] : memref<8x8x128xf32, #tpu.memory_space<vmem>>, vector<1x8x128xf32>
    %98 = vector.shape_cast %97 : vector<1x8x128xf32> to vector<8x128xf32>
    %99 = arith.truncf %91 : vector<8x128xf32> to vector<8x128xbf16>
    %cst_55 = arith.constant dense<0.000000e+00> : vector<8x128xf32>
    %100 = tpu.matmul %99, %16, %cst_55 {dimension_numbers = #tpu.dot_dimension_numbers<[1], [0], [0], [1], [0, 0, 1, 1], [], []>} : vector<8x128xbf16>, vector<128x128xbf16>, vector<8x128xf32> -> vector<8x128xf32>
    %101 = arith.addf %98, %100 : vector<8x128xf32>
    %102 = math.tanh %101 : vector<8x128xf32>
    %103 = arith.index_cast %c7_i32 : i32 to index
    %c0_56 = arith.constant 0 : index
    %c0_57 = arith.constant 0 : index
    %104 = vector.load %arg11[%103, %c0_56, %c0_57] : memref<8x8x128xf32, #tpu.memory_space<vmem>>, vector<1x8x128xf32>
    %105 = vector.shape_cast %104 : vector<1x8x128xf32> to vector<8x128xf32>
    %106 = vector.shape_cast %102 : vector<8x128xf32> to vector<1x8x128xf32>
    tpu.vector_store %arg11[%103, %c0_56, %c0_57], %106 {strides = array<i32>} : memref<8x8x128xf32, #tpu.memory_space<vmem>>, vector<1x8x128xf32>,
    %c8_i32 = arith.constant 8 : i32
    %c0_58 = arith.constant 0 : index
    %c0_59 = arith.constant 0 : index
    %c0_60 = arith.constant 0 : index
    %107 = vector.load %arg10[%c0_58, %c0_59, %c0_60] : memref<2x8x128xf32, #tpu.memory_space<vmem>>, vector<1x8x128xf32>
    %108 = vector.shape_cast %107 : vector<1x8x128xf32> to vector<8x128xf32>
    %109 = vector.shape_cast %102 : vector<8x128xf32> to vector<1x8x128xf32>
    tpu.vector_store %arg10[%c0_58, %c0_59, %c0_60], %109 {strides = array<i32>} : memref<2x8x128xf32, #tpu.memory_space<vmem>>, vector<1x8x128xf32>,
    %c0_61 = arith.constant 0 : index
    %c0_62 = arith.constant 0 : index
    %c0_63 = arith.constant 0 : index
    %110 = vector.load %arg11[%c0_61, %c0_62, %c0_63] : memref<8x8x128xf32, #tpu.memory_space<vmem>>, vector<8x8x128xf32>
    %111 = vector.shape_cast %110 : vector<8x8x128xf32> to vector<64x128xf32>
    %112 = arith.truncf %111 : vector<64x128xf32> to vector<64x128xbf16>
    %c0_64 = arith.constant 0 : index
    %c0_65 = arith.constant 0 : index
    %c0_66 = arith.constant 0 : index
    %113 = vector.load %arg4[%c0_64, %c0_65, %c0_66] : memref<1x128x128xbf16, #tpu.memory_space<vmem>>, vector<1x128x128xbf16>
    %114 = vector.shape_cast %113 : vector<1x128x128xbf16> to vector<128x128xbf16>
    %cst_67 = arith.constant dense<0.000000e+00> : vector<64x128xf32>
    %115 = tpu.matmul %112, %114, %cst_67 {dimension_numbers = #tpu.dot_dimension_numbers<[1], [0], [0], [1], [0, 0, 1, 1], [], []>} : vector<64x128xbf16>, vector<128x128xbf16>, vector<64x128xf32> -> vector<64x128xf32>
    %116 = vector.shape_cast %115 : vector<64x128xf32> to vector<8x8x128xf32>
    %c1 = arith.constant 1 : index
    %c0_68 = arith.constant 0 : index
    %c0_69 = arith.constant 0 : index
    %117 = vector.load %arg6[%c1, %c0_68, %c0_69] : memref<2x1x128xf32, #tpu.memory_space<vmem>>, vector<1x1x128xf32>
    %118 = vector.shape_cast %117 : vector<1x1x128xf32> to vector<1x128xf32>
    %119 = vector.shape_cast %118 : vector<1x128xf32> to vector<1x1x128xf32>
    %120 = vector.broadcast %119 : vector<1x1x128xf32> to vector<8x8x128xf32>
    %121 = arith.addf %116, %120 : vector<8x8x128xf32>
    %c0_70 = arith.constant 0 : index
    %c0_71 = arith.constant 0 : index
    %c0_72 = arith.constant 0 : index
    %122 = vector.load %arg11[%c0_70, %c0_71, %c0_72] : memref<8x8x128xf32, #tpu.memory_space<vmem>>, vector<8x8x128xf32>
    tpu.vector_store %arg11[%c0_70, %c0_71, %c0_72], %121 {strides = array<i32>} : memref<8x8x128xf32, #tpu.memory_space<vmem>>, vector<8x8x128xf32>,
    %c1_73 = arith.constant 1 : index
    %c0_74 = arith.constant 0 : index
    %c0_75 = arith.constant 0 : index
    %123 = vector.load %arg5[%c1_73, %c0_74, %c0_75] : memref<2x128x128xbf16, #tpu.memory_space<vmem>>, vector<1x128x128xbf16>
    %124 = vector.shape_cast %123 : vector<1x128x128xbf16> to vector<128x128xbf16>
    %c1_76 = arith.constant 1 : index
    %c0_77 = arith.constant 0 : index
    %c0_78 = arith.constant 0 : index
    %125 = vector.load %arg10[%c1_76, %c0_77, %c0_78] : memref<2x8x128xf32, #tpu.memory_space<vmem>>, vector<1x8x128xf32>
    %126 = vector.shape_cast %125 : vector<1x8x128xf32> to vector<8x128xf32>
    %c0_i32_79 = arith.constant 0 : i32
    %127 = arith.index_cast %c0_i32_79 : i32 to index
    %c0_80 = arith.constant 0 : index
    %c0_81 = arith.constant 0 : index
    %128 = vector.load %arg11[%127, %c0_80, %c0_81] : memref<8x8x128xf32, #tpu.memory_space<vmem>>, vector<1x8x128xf32>
    %129 = vector.shape_cast %128 : vector<1x8x128xf32> to vector<8x128xf32>
    %130 = arith.truncf %126 : vector<8x128xf32> to vector<8x128xbf16>
    %cst_82 = arith.constant dense<0.000000e+00> : vector<8x128xf32>
    %131 = tpu.matmul %130, %124, %cst_82 {dimension_numbers = #tpu.dot_dimension_numbers<[1], [0], [0], [1], [0, 0, 1, 1], [], []>} : vector<8x128xbf16>, vector<128x128xbf16>, vector<8x128xf32> -> vector<8x128xf32>
    %132 = arith.addf %129, %131 : vector<8x128xf32>
    %133 = math.tanh %132 : vector<8x128xf32>
    %c1_i32_83 = arith.constant 1 : i32
    %134 = arith.index_cast %c1_i32_83 : i32 to index
    %c0_84 = arith.constant 0 : index
    %c0_85 = arith.constant 0 : index
    %135 = vector.load %arg11[%134, %c0_84, %c0_85] : memref<8x8x128xf32, #tpu.memory_space<vmem>>, vector<1x8x128xf32>
    %136 = vector.shape_cast %135 : vector<1x8x128xf32> to vector<8x128xf32>
    %137 = arith.truncf %133 : vector<8x128xf32> to vector<8x128xbf16>
    %cst_86 = arith.constant dense<0.000000e+00> : vector<8x128xf32>
    %138 = tpu.matmul %137, %124, %cst_86 {dimension_numbers = #tpu.dot_dimension_numbers<[1], [0], [0], [1], [0, 0, 1, 1], [], []>} : vector<8x128xbf16>, vector<128x128xbf16>, vector<8x128xf32> -> vector<8x128xf32>
    %139 = arith.addf %136, %138 : vector<8x128xf32>
    %140 = math.tanh %139 : vector<8x128xf32>
    %c2_i32_87 = arith.constant 2 : i32
    %141 = arith.index_cast %c2_i32_87 : i32 to index
    %c0_88 = arith.constant 0 : index
    %c0_89 = arith.constant 0 : index
    %142 = vector.load %arg11[%141, %c0_88, %c0_89] : memref<8x8x128xf32, #tpu.memory_space<vmem>>, vector<1x8x128xf32>
    %143 = vector.shape_cast %142 : vector<1x8x128xf32> to vector<8x128xf32>
    %144 = arith.truncf %140 : vector<8x128xf32> to vector<8x128xbf16>
    %cst_90 = arith.constant dense<0.000000e+00> : vector<8x128xf32>
    %145 = tpu.matmul %144, %124, %cst_90 {dimension_numbers = #tpu.dot_dimension_numbers<[1], [0], [0], [1], [0, 0, 1, 1], [], []>} : vector<8x128xbf16>, vector<128x128xbf16>, vector<8x128xf32> -> vector<8x128xf32>
    %146 = arith.addf %143, %145 : vector<8x128xf32>
    %147 = math.tanh %146 : vector<8x128xf32>
    %c3_i32_91 = arith.constant 3 : i32
    %148 = arith.index_cast %c3_i32_91 : i32 to index
    %c0_92 = arith.constant 0 : index
    %c0_93 = arith.constant 0 : index
    %149 = vector.load %arg11[%148, %c0_92, %c0_93] : memref<8x8x128xf32, #tpu.memory_space<vmem>>, vector<1x8x128xf32>
    %150 = vector.shape_cast %149 : vector<1x8x128xf32> to vector<8x128xf32>
    %151 = arith.truncf %147 : vector<8x128xf32> to vector<8x128xbf16>
    %cst_94 = arith.constant dense<0.000000e+00> : vector<8x128xf32>
    %152 = tpu.matmul %151, %124, %cst_94 {dimension_numbers = #tpu.dot_dimension_numbers<[1], [0], [0], [1], [0, 0, 1, 1], [], []>} : vector<8x128xbf16>, vector<128x128xbf16>, vector<8x128xf32> -> vector<8x128xf32>
    %153 = arith.addf %150, %152 : vector<8x128xf32>
    %154 = math.tanh %153 : vector<8x128xf32>
    %c4_i32_95 = arith.constant 4 : i32
    %155 = arith.index_cast %c4_i32_95 : i32 to index
    %c0_96 = arith.constant 0 : index
    %c0_97 = arith.constant 0 : index
    %156 = vector.load %arg11[%155, %c0_96, %c0_97] : memref<8x8x128xf32, #tpu.memory_space<vmem>>, vector<1x8x128xf32>
    %157 = vector.shape_cast %156 : vector<1x8x128xf32> to vector<8x128xf32>
    %158 = arith.truncf %154 : vector<8x128xf32> to vector<8x128xbf16>
    %cst_98 = arith.constant dense<0.000000e+00> : vector<8x128xf32>
    %159 = tpu.matmul %158, %124, %cst_98 {dimension_numbers = #tpu.dot_dimension_numbers<[1], [0], [0], [1], [0, 0, 1, 1], [], []>} : vector<8x128xbf16>, vector<128x128xbf16>, vector<8x128xf32> -> vector<8x128xf32>
    %160 = arith.addf %157, %159 : vector<8x128xf32>
    %161 = math.tanh %160 : vector<8x128xf32>
    %c5_i32_99 = arith.constant 5 : i32
    %162 = arith.index_cast %c5_i32_99 : i32 to index
    %c0_100 = arith.constant 0 : index
    %c0_101 = arith.constant 0 : index
    %163 = vector.load %arg11[%162, %c0_100, %c0_101] : memref<8x8x128xf32, #tpu.memory_space<vmem>>, vector<1x8x128xf32>
    %164 = vector.shape_cast %163 : vector<1x8x128xf32> to vector<8x128xf32>
    %165 = arith.truncf %161 : vector<8x128xf32> to vector<8x128xbf16>
    %cst_102 = arith.constant dense<0.000000e+00> : vector<8x128xf32>
    %166 = tpu.matmul %165, %124, %cst_102 {dimension_numbers = #tpu.dot_dimension_numbers<[1], [0], [0], [1], [0, 0, 1, 1], [], []>} : vector<8x128xbf16>, vector<128x128xbf16>, vector<8x128xf32> -> vector<8x128xf32>
    %167 = arith.addf %164, %166 : vector<8x128xf32>
    %168 = math.tanh %167 : vector<8x128xf32>
    %c6_i32_103 = arith.constant 6 : i32
    %169 = arith.index_cast %c6_i32_103 : i32 to index
    %c0_104 = arith.constant 0 : index
    %c0_105 = arith.constant 0 : index
    %170 = vector.load %arg11[%169, %c0_104, %c0_105] : memref<8x8x128xf32, #tpu.memory_space<vmem>>, vector<1x8x128xf32>
    %171 = vector.shape_cast %170 : vector<1x8x128xf32> to vector<8x128xf32>
    %172 = arith.truncf %168 : vector<8x128xf32> to vector<8x128xbf16>
    %cst_106 = arith.constant dense<0.000000e+00> : vector<8x128xf32>
    %173 = tpu.matmul %172, %124, %cst_106 {dimension_numbers = #tpu.dot_dimension_numbers<[1], [0], [0], [1], [0, 0, 1, 1], [], []>} : vector<8x128xbf16>, vector<128x128xbf16>, vector<8x128xf32> -> vector<8x128xf32>
    %174 = arith.addf %171, %173 : vector<8x128xf32>
    %175 = math.tanh %174 : vector<8x128xf32>
    %c7_i32_107 = arith.constant 7 : i32
    %176 = arith.index_cast %c7_i32_107 : i32 to index
    %c0_108 = arith.constant 0 : index
    %c0_109 = arith.constant 0 : index
    %177 = vector.load %arg11[%176, %c0_108, %c0_109] : memref<8x8x128xf32, #tpu.memory_space<vmem>>, vector<1x8x128xf32>
    %178 = vector.shape_cast %177 : vector<1x8x128xf32> to vector<8x128xf32>
    %179 = arith.truncf %175 : vector<8x128xf32> to vector<8x128xbf16>
    %cst_110 = arith.constant dense<0.000000e+00> : vector<8x128xf32>
    %180 = tpu.matmul %179, %124, %cst_110 {dimension_numbers = #tpu.dot_dimension_numbers<[1], [0], [0], [1], [0, 0, 1, 1], [], []>} : vector<8x128xbf16>, vector<128x128xbf16>, vector<8x128xf32> -> vector<8x128xf32>
    %181 = arith.addf %178, %180 : vector<8x128xf32>
    %182 = math.tanh %181 : vector<8x128xf32>
    %c8_i32_111 = arith.constant 8 : i32
    %c1_112 = arith.constant 1 : index
    %c0_113 = arith.constant 0 : index
    %c0_114 = arith.constant 0 : index
    %183 = vector.load %arg10[%c1_112, %c0_113, %c0_114] : memref<2x8x128xf32, #tpu.memory_space<vmem>>, vector<1x8x128xf32>
    %184 = vector.shape_cast %183 : vector<1x8x128xf32> to vector<8x128xf32>
    %185 = vector.shape_cast %182 : vector<8x128xf32> to vector<1x8x128xf32>
    tpu.vector_store %arg10[%c1_112, %c0_113, %c0_114], %185 {strides = array<i32>} : memref<2x8x128xf32, #tpu.memory_space<vmem>>, vector<1x8x128xf32>,
    %c0_i32_115 = arith.constant 0 : i32
    %186 = arith.cmpi eq, %arg1, %c0_i32_115 : i32
    %187 = arith.extui %186 : i1 to i32
    %c0_i32_116 = arith.constant 0 : i32
    %188 = arith.cmpi ne, %187, %c0_i32_116 : i32
    scf.if %188 {
      %c1_117 = arith.constant 1 : index
      %c0_118 = arith.constant 0 : index
      %c0_119 = arith.constant 0 : index
      %189 = vector.load %arg10[%c1_117, %c0_118, %c0_119] : memref<2x8x128xf32, #tpu.memory_space<vmem>>, vector<1x8x128xf32>
      %190 = vector.shape_cast %189 : vector<1x8x128xf32> to vector<8x128xf32>
      %191 = arith.truncf %190 : vector<8x128xf32> to vector<8x128xbf16>
      %c0_120 = arith.constant 0 : index
      %c0_121 = arith.constant 0 : index
      %192 = vector.load %arg7[%c0_120, %c0_121] : memref<128x128xbf16, #tpu.memory_space<vmem>>, vector<128x128xbf16>
      %cst_122 = arith.constant dense<0.000000e+00> : vector<8x128xf32>
      %193 = tpu.matmul %191, %192, %cst_122 {dimension_numbers = #tpu.dot_dimension_numbers<[1], [0], [0], [1], [0, 0, 1, 1], [], []>} : vector<8x128xbf16>, vector<128x128xbf16>, vector<8x128xf32> -> vector<8x128xf32>
      %c0_123 = arith.constant 0 : index
      %c0_124 = arith.constant 0 : index
      %194 = vector.load %arg8[%c0_123, %c0_124] : memref<1x128xf32, #tpu.memory_space<vmem>>, vector<1x128xf32>
      %195 = vector.broadcast %194 : vector<1x128xf32> to vector<8x128xf32>
      %196 = arith.addf %193, %195 : vector<8x128xf32>
      %c0_125 = arith.constant 0 : index
      %c0_126 = arith.constant 0 : index
      %197 = vector.load %arg9[%c0_125, %c0_126] : memref<8x128xf32, #tpu.memory_space<vmem>>, vector<8x128xf32>
      tpu.vector_store %arg9[%c0_125, %c0_126], %196 {strides = array<i32>} : memref<8x128xf32, #tpu.memory_space<vmem>>, vector<8x128xf32>,
    } else {
    }
    return
  }
  func.func @transform_0(%arg0: i32, %arg1: i32) -> (i32, i32, i32) {
    %c0_i32 = arith.constant 0 : i32
    %c0_i32_0 = arith.constant 0 : i32
    return %arg1, %arg0, %c0_i32 : i32, i32, i32
  }
  func.func @transform_1(%arg0: i32, %arg1: i32) -> (i32, i32) {
    %c0_i32 = arith.constant 0 : i32
    %c0_i32_0 = arith.constant 0 : i32
    %c0_i32_1 = arith.constant 0 : i32
    return %c0_i32, %c0_i32_0 : i32, i32
  }
  func.func @transform_2(%arg0: i32, %arg1: i32) -> (i32, i32, i32) {
    %c0_i32 = arith.constant 0 : i32
    %c0_i32_0 = arith.constant 0 : i32
    %c0_i32_1 = arith.constant 0 : i32
    %c0_i32_2 = arith.constant 0 : i32
    return %c0_i32, %c0_i32_0, %c0_i32_1 : i32, i32, i32
  }
  func.func @transform_3(%arg0: i32, %arg1: i32) -> (i32, i32, i32) {
    %c0_i32 = arith.constant 0 : i32
    %c0_i32_0 = arith.constant 0 : i32
    %c0_i32_1 = arith.constant 0 : i32
    %c0_i32_2 = arith.constant 0 : i32
    return %c0_i32, %c0_i32_0, %c0_i32_1 : i32, i32, i32
  }
  func.func @transform_4(%arg0: i32, %arg1: i32) -> (i32, i32, i32) {
    %c0_i32 = arith.constant 0 : i32
    %c0_i32_0 = arith.constant 0 : i32
    %c0_i32_1 = arith.constant 0 : i32
    %c0_i32_2 = arith.constant 0 : i32
    return %c0_i32, %c0_i32_0, %c0_i32_1 : i32, i32, i32
  }
  func.func @transform_5(%arg0: i32, %arg1: i32) -> (i32, i32) {
    %c0_i32 = arith.constant 0 : i32
    %c0_i32_0 = arith.constant 0 : i32
    %c0_i32_1 = arith.constant 0 : i32
    return %c0_i32, %c0_i32_0 : i32, i32
  }
  func.func @transform_6(%arg0: i32, %arg1: i32) -> (i32, i32) {
    %c0_i32 = arith.constant 0 : i32
    %c0_i32_0 = arith.constant 0 : i32
    %c0_i32_1 = arith.constant 0 : i32
    return %c0_i32, %c0_i32_0 : i32, i32
  }
  func.func @transform_7(%arg0: i32, %arg1: i32) -> (i32, i32) {
    %c0_i32 = arith.constant 0 : i32
    %c0_i32_0 = arith.constant 0 : i32
    return %arg0, %c0_i32 : i32, i32
  }
}

</mosaic_0001>

<bundles_post_ra>
// kernel: rnn_model_forward.1
= control target key start
LH: loop header
LB: loop body
LE: loop exit
PB: predicated region body
PF: predicated region fallthrough
CT: control target
= control target key end

     0   :  { %v2036_v0 = vmov 0.0   ;;  %vm2037_vm0 = vmmov 0   ;;  %v2038_v23 = vmov 0.0|0.0   ;;  %s2634_s1 = inlined_call_operand.vmem [shape: bf16[128,128], index: 1, kind: input, shape index: {}]   ;;  %s2635_s3 = inlined_call_operand.vmem [shape: bf16[2,128,128], index: 3, kind: input, shape index: {}]   ;;  %s2636_s0 = inlined_call_operand.vmem [shape: f32[8,8,128], index: 0, kind: input, shape index: {}]   ;;  %s2637_s4 = inlined_call_operand.vmem [shape: f32[2,1,128], index: 4, kind: input, shape index: {}]   ;;  %s2638_s2 = inlined_call_operand.vmem [shape: bf16[1,128,128], index: 2, kind: input, shape index: {}]   ;;  %s2639_s5 = inlined_call_operand.vmem [shape: bf16[128,128], index: 5, kind: input, shape index: {}]   ;;  %s2640_s6 = inlined_call_operand.vmem [shape: f32[1,128], index: 6, kind: input, shape index: {}]   ;;  %s2641_s7 = inlined_call_operand.vmem [shape: f32[8,128], index: 7, kind: output, shape index: {}]  }
   0x1   :  { %1597 = vmatprep.subr.bf16.mxu1 %v2036_v0  ;;  %v1964_v1 = vld [vmem:[%s2634_s1 + $0x38] sm:$0xff]   ;;  %1613 = vmatprep.mubr.msk.bf16.mxu1 %vm2037_vm0, %v2036_v0  ;;  %v1966_v3 = vld [vmem:[%s2634_s1 + $0x30] sm:$0xff]   ;;  %v1968_v5 = vld [vmem:[%s2634_s1 + $0x28] sm:$0xff]  }
   0x2   :  { %v2088_v2 = vld [vmem:[%s2635_s3 + $0x38] sm:$0xff]   ;;  %1573 = vmatprep.subr.bf16.mxu0 %v1964_v1  ;;  %v2097_v4 = vld [vmem:[%s2635_s3 + $0x30] sm:$0xff]   ;;  %v2107_v6 = vld [vmem:[%s2635_s3 + $0x28] sm:$0xff]  }
   0x3   :  { %1598 = vmatpush3.bf16.msra.mxu1 %v2088_v2  ;;  %1574 = vmatpush3.bf16.msra.mxu0 %v1964_v1  ;;  %v1970_v7 = vld [vmem:[%s2634_s1 + $0x20] sm:$0xff]   ;;  %v1972_v9 = vld [vmem:[%s2634_s1 + $0x18] sm:$0xff]   ;;  %v1974_v11 = vld [vmem:[%s2634_s1 + $0x10] sm:$0xff]  }
   0x4   :  { %1599 = vmatprep.subr.bf16.mxu1 %v2036_v0  ;;  %1575 = vmatprep.subr.bf16.mxu0 %v1966_v3  ;;  %v2117_v8 = vld [vmem:[%s2635_s3 + $0x20] sm:$0xff]   ;;  %v2127_v10 = vld [vmem:[%s2635_s3 + $0x18] sm:$0xff]   ;;  %v34_v13 = vld [vmem:[%s2636_s0 + $0x8] sm:$0xff] }
   0x5   :  { %v33_v12 = vld [vmem:[%s2636_s0] sm:$0xff]  ;;  %v2142_v14 = vld [vmem:[%s2635_s3 + $0x10] sm:$0xff]   ;;  %v1976_v16 = vld [vmem:[%s2634_s1 + $0x8] sm:$0xff]  }
   0x6   :  { %v41_v15 = vpack.c.bf16 %v34_v13, %v33_v12  ;;  %v2153_v17 = vld [vmem:[%s2635_s3 + $0x8] sm:$0xff]   ;;  %v1978_v18 = vld [vmem:[%s2634_s1] sm:$0xff]   ;;  %v35_v20 = vld [vmem:[%s2636_s0 + $0x10] sm:$0xff] }
   0x7   :  { %1600 = vmatpush3.bf16.msra.mxu1 %v2097_v4  ;;  %1576 = vmatpush3.bf16.msra.mxu0 %v1966_v3  ;;  %v2163_v19 = vld [vmem:[%s2635_s3] sm:$0xff]   ;;  %v36_v21 = vld [vmem:[%s2636_s0 + $0x18] sm:$0xff]  ;;  %v38_v25 = vld [vmem:[%s2636_s0 + $0x28] sm:$0xff] }
   0x8   :  { %1601 = vmatprep.subr.bf16.mxu1 %v2036_v0  ;;  %1577 = vmatprep.subr.bf16.mxu0 %v1968_v5  ;;  %v42_v22 = vpack.c.bf16 %v36_v21, %v35_v20  ;;  %v37_v24 = vld [vmem:[%s2636_s0 + $0x20] sm:$0xff]  ;;  %v39_v27 = vld [vmem:[%s2636_s0 + $0x30] sm:$0xff]  ;;  %v40_v28 = vld [vmem:[%s2636_s0 + $0x38] sm:$0xff] }
   0x9   :  { %1589 = vmatprep.mubr.bf16.mxu0 %v41_v15  ;;  %v43_v26 = vpack.c.bf16 %v38_v25, %v37_v24  ;;  %v44_v29 = vpack.c.bf16 %v40_v28, %v39_v27  ;;  %v2227_v32 = vld [vmem:[%s2637_s4] ss:$0 sm:$0xff]  ;;  %v1982_v28 = vld [vmem:[%s2638_s2 + $0x28] sm:$0xff]  }
   0xb   :  { %1602 = vmatpush3.bf16.msra.mxu1 %v2107_v6  ;;  %1578 = vmatpush3.bf16.msra.mxu0 %v1968_v5 }
   0xc   :  { %1603 = vmatprep.subr.bf16.mxu1 %v2036_v0  ;;  %1579 = vmatprep.subr.bf16.mxu0 %v1970_v7 }
   0xf   :  { %1604 = vmatpush3.bf16.msra.mxu1 %v2117_v8  ;;  %1580 = vmatpush3.bf16.msra.mxu0 %v1970_v7 }
  0x10   :  { %1605 = vmatprep.subr.bf16.mxu1 %v2036_v0  ;;  %1581 = vmatprep.subr.bf16.mxu0 %v1972_v9 }
  0x13   :  { %1606 = vmatpush3.bf16.msra.mxu1 %v2127_v10  ;;  %1582 = vmatpush3.bf16.msra.mxu0 %v1972_v9 }
  0x14   :  { %1607 = vmatprep.subr.bf16.mxu1 %v2036_v0  ;;  %1583 = vmatprep.subr.bf16.mxu0 %v1974_v11 }
  0x17   :  { %1608 = vmatpush3.bf16.msra.mxu1 %v2142_v14  ;;  %1584 = vmatpush3.bf16.msra.mxu0 %v1974_v11 }
  0x18   :  { %1609 = vmatprep.subr.bf16.mxu1 %v2036_v0  ;;  %1585 = vmatprep.subr.bf16.mxu0 %v1976_v16 }
  0x1b   :  { %1610 = vmatpush3.bf16.msra.mxu1 %v2153_v17  ;;  %1586 = vmatpush3.bf16.msra.mxu0 %v1976_v16 }
  0x1c   :  { %1611 = vmatprep.subr.bf16.mxu1 %v2036_v0  ;;  %1587 = vmatprep.subr.bf16.mxu0 %v1978_v18 }
  0x1f   :  { %1612 = vmatpush3.bf16.msra.mxu1 %v2163_v19  ;;  %1588 = vmatpush3.bf16.msra.mxu0 %v1978_v18 }
  0x20   :  { %1617 = vmatprep.subr.bf16.mxu0 %v2036_v0  ;;  %1637 = vmatprep.subr.bf16.mxu1 %v2036_v0 }
  0x22   :  { %1614 = vmatmul.mubr.bf16.vlgmr.msra.gmra.mxu1 %v2038_v23  ;;  %1590 = vmatmul.mubr.bf16.vlgmr.msra.gmra.mxu0 %v42_v22 }
  0x23   :  { %1618 = vmatpush3.bf16.msra.mxu0 %v2088_v2  ;;  %1638 = vmatpush3.bf16.msra.mxu1 %v2088_v2 }
  0x24   :  { %1619 = vmatprep.subr.bf16.mxu0 %v2036_v0  ;;  %1639 = vmatprep.subr.bf16.mxu1 %v2036_v0 }
  0x25   :  { %1653 = vmatprep.mubr.msk.bf16.mxu1 %vm2037_vm0, %v2036_v0  ;;  %1593 = vmatprep.mubr.bf16.mxu0 %v43_v26 }
  0x27   :  { %1620 = vmatpush3.bf16.msra.mxu0 %v2097_v4  ;;  %1640 = vmatpush3.bf16.msra.mxu1 %v2097_v4 }
  0x28   :  { %1621 = vmatprep.subr.bf16.mxu0 %v2036_v0  ;;  %1641 = vmatprep.subr.bf16.mxu1 %v2036_v0 }
  0x2a   :  { %1594 = vmatmul.mubr.bf16.gmra.mxu0 %v44_v29  ;;  %v1983_v29 = vld [vmem:[%s2638_s2 + $0x20] sm:$0xff]  }
  0x2b   :  { %1622 = vmatpush3.bf16.msra.mxu0 %v2107_v6  ;;  %1642 = vmatpush3.bf16.msra.mxu1 %v2107_v6 }
  0x2c   :  { %1623 = vmatprep.subr.bf16.mxu0 %v2036_v0  ;;  %1643 = vmatprep.subr.bf16.mxu1 %v2036_v0 }
  0x2d   :  { %1633 = vmatprep.mubr.msk.bf16.mxu0 %vm2037_vm0, %v2036_v0 }
  0x2f   :  { %1624 = vmatpush3.bf16.msra.mxu0 %v2117_v8  ;;  %1644 = vmatpush3.bf16.msra.mxu1 %v2117_v8 }
  0x30   :  { %1625 = vmatprep.subr.bf16.mxu0 %v2036_v0  ;;  %1645 = vmatprep.subr.bf16.mxu1 %v2036_v0 }
  0x33   :  { %1626 = vmatpush3.bf16.msra.mxu0 %v2127_v10  ;;  %1646 = vmatpush3.bf16.msra.mxu1 %v2127_v10 }
  0x34   :  { %1627 = vmatprep.subr.bf16.mxu0 %v2036_v0  ;;  %1647 = vmatprep.subr.bf16.mxu1 %v2036_v0 }
  0x37   :  { %1628 = vmatpush3.bf16.msra.mxu0 %v2142_v14  ;;  %1648 = vmatpush3.bf16.msra.mxu1 %v2142_v14 }
  0x38   :  { %1629 = vmatprep.subr.bf16.mxu0 %v2036_v0  ;;  %1649 = vmatprep.subr.bf16.mxu1 %v2036_v0 }
  0x3b   :  { %1630 = vmatpush3.bf16.msra.mxu0 %v2153_v17  ;;  %1650 = vmatpush3.bf16.msra.mxu1 %v2153_v17 }
  0x3c   :  { %1631 = vmatprep.subr.bf16.mxu0 %v2036_v0  ;;  %1651 = vmatprep.subr.bf16.mxu1 %v2036_v0 }
  0x3f   :  { %1632 = vmatpush3.bf16.msra.mxu0 %v2163_v19  ;;  %1652 = vmatpush3.bf16.msra.mxu1 %v2163_v19 }
  0x40   :  { %1657 = vmatprep.subr.bf16.mxu0 %v2036_v0  ;;  %1677 = vmatprep.subr.bf16.mxu1 %v2036_v0 }
  0xe2   :  { %v298_v30 = vpop.f32.mrf.mxu1  ;;  %v1591_v31 = vpop.f32.mrf.mxu0 }
  0xe3   :  { %v183_v55 = vadd.f32 %v1591_v31, %v2227_v32  ;;  %v1985_v31 = vld [vmem:[%s2638_s2 + $0x10] sm:$0xff]  }
  0xe4   :  { %v1615_v33 = vpop.f32.mrf.mxu1  ;;  %v143_v34 = vpop.f32.mrf.mxu0 }
  0xe5   :  { %v181_v35 = vadd.f32 %v2227_v32, %v143_v34  ;;  %v1986_v33 = vld [vmem:[%s2638_s2 + $0x8] sm:$0xff]   ;;  %v1987_v34 = vld [vmem:[%s2638_s2] sm:$0xff]  }
  0xe6   :  { %v301_v36 = vpop.f32.mrf.mxu1  ;;  %v1592_v41 = vpop.f32.mrf.mxu0 }
  0xe7   :  { %v304_v37 = vadd.f32 %v298_v30, %v181_v35  ;;  %v184_v63 = vadd.f32 %v1592_v41, %v2227_v32  ;;  %v1984_v30 = vld [vmem:[%s2638_s2 + $0x18] sm:$0xff]  }
  0xe8   :  { %v1616_v38 = vpop.f32.mrf.mxu1  ;;  %v146_v42 = vpop.f32.mrf.mxu0  ;;  %v2410_v41 = vld [vmem:[%s2635_s3 + $0x58] sm:$0xff]  }
  0xe9   :  { %2004 = vtanh.f32 %v304_v37  ;;  %v182_v47 = vadd.f32 %v2227_v32, %v146_v42  ;;  %v2382_v37 = vld [vmem:[%s2635_s3 + $0x78] sm:$0xff]   ;;  %v2389_v38 = vld [vmem:[%s2635_s3 + $0x70] sm:$0xff]  }
  0xea   :  { %v2252_v43 = vpop.f32.mrf.mxu0  ;;  %v2417_v42 = vld [vmem:[%s2635_s3 + $0x50] sm:$0xff]  }
  0xec   :  { %v2254_v44 = vpop.f32.mrf.mxu0 }
  0xed   :  { %v185_v13 = vadd.f32 %v2227_v32, %v2254_v44  ;;  %v2424_v44 = vld [vmem:[%s2635_s3 + $0x48] sm:$0xff]  }
  0xee   :  { %v2256_v45 = vpop.f32.mrf.mxu0 }
  0xf0   :  { %v2258_v46 = vpop.f32.mrf.mxu0 }
  0xf6   :  { %v2230_v39 = vpop.eup %2004 }
  0xf7   :  { %v309_v40 = vpack.c.bf16 %v2230_v39, %v2230_v39 }
  0xf9   :  { %1634 = vmatmul.mubr.bf16.vlgmr.msra.gmra.mxu0 %v309_v40  ;;  %v2403_v40 = vld [vmem:[%s2635_s3 + $0x60] sm:$0xff]  }
  0xfa   :  { %1658 = vmatpush3.bf16.msra.mxu0 %v2088_v2  ;;  %1673 = vmatprep.mubr.msk.bf16.mxu0 %vm2037_vm0, %v2036_v0 }
  0xfb   :  { %1659 = vmatprep.subr.bf16.mxu0 %v2036_v0 }
  0xfe   :  { %1660 = vmatpush3.bf16.msra.mxu0 %v2097_v4 }
  0xff   :  { %1661 = vmatprep.subr.bf16.mxu0 %v2036_v0 }
 0x102   :  { %1662 = vmatpush3.bf16.msra.mxu0 %v2107_v6 }
 0x103   :  { %1663 = vmatprep.subr.bf16.mxu0 %v2036_v0 }
 0x106   :  { %1664 = vmatpush3.bf16.msra.mxu0 %v2117_v8 }
 0x107   :  { %1665 = vmatprep.subr.bf16.mxu0 %v2036_v0 }
 0x10a   :  { %1666 = vmatpush3.bf16.msra.mxu0 %v2127_v10 }
 0x10b   :  { %1667 = vmatprep.subr.bf16.mxu0 %v2036_v0 }
 0x10e   :  { %1668 = vmatpush3.bf16.msra.mxu0 %v2142_v14 }
 0x10f   :  { %1669 = vmatprep.subr.bf16.mxu0 %v2036_v0 }
 0x112   :  { %1670 = vmatpush3.bf16.msra.mxu0 %v2153_v17 }
 0x113   :  { %1671 = vmatprep.subr.bf16.mxu0 %v2036_v0 }
 0x116   :  { %1672 = vmatpush3.bf16.msra.mxu0 %v2163_v19 }
 0x117   :  { %1697 = vmatprep.subr.bf16.mxu0 %v2036_v0 }
 0x1b9   :  { %v344_v48 = vpop.f32.mrf.mxu0 }
 0x1ba   :  { %v350_v49 = vadd.f32 %v344_v48, %v182_v47  ;;  %v187_v47 = vadd.f32 %v2252_v43, %v2227_v32 }
 0x1bb   :  { %v1635_v50 = vpop.f32.mrf.mxu0 }
 0x1bc   :  { %2006 = vtanh.f32 %v350_v49 }
 0x1bd   :  { %v347_v51 = vpop.f32.mrf.mxu0 }
 0x1bf   :  { %v1636_v52 = vpop.f32.mrf.mxu0 }
 0x1c9   :  { %v2261_v53 = vpop.eup %2006 }
 0x1ca   :  { %v355_v54 = vpack.c.bf16 %v2261_v53, %v2261_v53  ;;  %v638_v27 = vpack.c.bf16 %v2261_v53, %v2230_v39  ;;  %v2396_v39 = vld [vmem:[%s2635_s3 + $0x68] sm:$0xff]  }
 0x1cc   :  { %1654 = vmatmul.mubr.bf16.vlgmr.msra.gmra.mxu1 %v355_v54 }
 0x1cd   :  { %1678 = vmatpush3.bf16.msra.mxu1 %v2088_v2  ;;  %1693 = vmatprep.mubr.msk.bf16.mxu1 %vm2037_vm0, %v2036_v0 }
 0x1ce   :  { %1679 = vmatprep.subr.bf16.mxu1 %v2036_v0 }
 0x1d1   :  { %1680 = vmatpush3.bf16.msra.mxu1 %v2097_v4 }
 0x1d2   :  { %1681 = vmatprep.subr.bf16.mxu1 %v2036_v0 }
 0x1d5   :  { %1682 = vmatpush3.bf16.msra.mxu1 %v2107_v6 }
 0x1d6   :  { %1683 = vmatprep.subr.bf16.mxu1 %v2036_v0 }
 0x1d9   :  { %1684 = vmatpush3.bf16.msra.mxu1 %v2117_v8 }
 0x1da   :  { %1685 = vmatprep.subr.bf16.mxu1 %v2036_v0 }
 0x1dd   :  { %1686 = vmatpush3.bf16.msra.mxu1 %v2127_v10 }
 0x1de   :  { %1687 = vmatprep.subr.bf16.mxu1 %v2036_v0 }
 0x1e1   :  { %1688 = vmatpush3.bf16.msra.mxu1 %v2142_v14 }
 0x1e2   :  { %1689 = vmatprep.subr.bf16.mxu1 %v2036_v0 }
 0x1e5   :  { %1690 = vmatpush3.bf16.msra.mxu1 %v2153_v17 }
 0x1e6   :  { %1691 = vmatprep.subr.bf16.mxu1 %v2036_v0 }
 0x1e9   :  { %1692 = vmatpush3.bf16.msra.mxu1 %v2163_v19 }
 0x1ea   :  { %1717 = vmatprep.subr.bf16.mxu1 %v2036_v0 }
 0x28c   :  { %v390_v56 = vpop.f32.mrf.mxu1 }
 0x28d   :  { %v396_v57 = vadd.f32 %v390_v56, %v183_v55 }
 0x28e   :  { %v1655_v58 = vpop.f32.mrf.mxu1 }
 0x28f   :  { %2008 = vtanh.f32 %v396_v57 }
 0x290   :  { %v393_v59 = vpop.f32.mrf.mxu1 }
 0x292   :  { %v1656_v60 = vpop.f32.mrf.mxu1 }
 0x29c   :  { %v2284_v61 = vpop.eup %2008 }
 0x29d   :  { %v401_v62 = vpack.c.bf16 %v2284_v61, %v2284_v61 }
 0x29f   :  { %1674 = vmatmul.mubr.bf16.vlgmr.msra.gmra.mxu0 %v401_v62 }
 0x2a0   :  { %1698 = vmatpush3.bf16.msra.mxu0 %v2088_v2  ;;  %1713 = vmatprep.mubr.msk.bf16.mxu0 %vm2037_vm0, %v2036_v0 }
 0x2a1   :  { %1699 = vmatprep.subr.bf16.mxu0 %v2036_v0 }
 0x2a4   :  { %1700 = vmatpush3.bf16.msra.mxu0 %v2097_v4 }
 0x2a5   :  { %1701 = vmatprep.subr.bf16.mxu0 %v2036_v0 }
 0x2a8   :  { %1702 = vmatpush3.bf16.msra.mxu0 %v2107_v6 }
 0x2a9   :  { %1703 = vmatprep.subr.bf16.mxu0 %v2036_v0 }
 0x2ac   :  { %1704 = vmatpush3.bf16.msra.mxu0 %v2117_v8 }
 0x2ad   :  { %1705 = vmatprep.subr.bf16.mxu0 %v2036_v0 }
 0x2b0   :  { %1706 = vmatpush3.bf16.msra.mxu0 %v2127_v10 }
 0x2b1   :  { %1707 = vmatprep.subr.bf16.mxu0 %v2036_v0 }
 0x2b4   :  { %1708 = vmatpush3.bf16.msra.mxu0 %v2142_v14 }
 0x2b5   :  { %1709 = vmatprep.subr.bf16.mxu0 %v2036_v0 }
 0x2b8   :  { %1710 = vmatpush3.bf16.msra.mxu0 %v2153_v17 }
 0x2b9   :  { %1711 = vmatprep.subr.bf16.mxu0 %v2036_v0 }
 0x2bc   :  { %1712 = vmatpush3.bf16.msra.mxu0 %v2163_v19 }
 0x2bd   :  { %1737 = vmatprep.subr.bf16.mxu0 %v2036_v0 }
 0x35f   :  { %v436_v1 = vpop.f32.mrf.mxu0 }
 0x360   :  { %v442_v3 = vadd.f32 %v436_v1, %v184_v63  ;;  %v2483_v63 = vld [vmem:[%s2637_s4 + $0x1] ss:$0 sm:$0xff] }
 0x361   :  { %v1675_v5 = vpop.f32.mrf.mxu0 }
 0x362   :  { %2010 = vtanh.f32 %v442_v3 }
 0x363   :  { %v439_v7 = vpop.f32.mrf.mxu0 }
 0x365   :  { %v1676_v9 = vpop.f32.mrf.mxu0 }
 0x36f   :  { %v2307_v11 = vpop.eup %2010 }
 0x370   :  { %v447_v12 = vpack.c.bf16 %v2307_v11, %v2307_v11  ;;  %v639_v35 = vpack.c.bf16 %v2307_v11, %v2284_v61 }
 0x372   :  { %1694 = vmatmul.mubr.bf16.vlgmr.msra.gmra.mxu1 %v447_v12 }
 0x373   :  { %1718 = vmatpush3.bf16.msra.mxu1 %v2088_v2  ;;  %1733 = vmatprep.mubr.msk.bf16.mxu1 %vm2037_vm0, %v2036_v0 }
 0x374   :  { %1719 = vmatprep.subr.bf16.mxu1 %v2036_v0 }
 0x377   :  { %1720 = vmatpush3.bf16.msra.mxu1 %v2097_v4 }
 0x378   :  { %1721 = vmatprep.subr.bf16.mxu1 %v2036_v0 }
 0x37b   :  { %1722 = vmatpush3.bf16.msra.mxu1 %v2107_v6 }
 0x37c   :  { %1723 = vmatprep.subr.bf16.mxu1 %v2036_v0 }
 0x37f   :  { %1724 = vmatpush3.bf16.msra.mxu1 %v2117_v8 }
 0x380   :  { %1725 = vmatprep.subr.bf16.mxu1 %v2036_v0 }
 0x383   :  { %1726 = vmatpush3.bf16.msra.mxu1 %v2127_v10 }
 0x384   :  { %1727 = vmatprep.subr.bf16.mxu1 %v2036_v0 }
 0x387   :  { %1728 = vmatpush3.bf16.msra.mxu1 %v2142_v14 }
 0x388   :  { %1729 = vmatprep.subr.bf16.mxu1 %v2036_v0 }
 0x38b   :  { %1730 = vmatpush3.bf16.msra.mxu1 %v2153_v17 }
 0x38c   :  { %1731 = vmatprep.subr.bf16.mxu1 %v2036_v0 }
 0x38f   :  { %1732 = vmatpush3.bf16.msra.mxu1 %v2163_v19 }
 0x432   :  { %v482_v15 = vpop.f32.mrf.mxu1 }
 0x433   :  { %v488_v16 = vadd.f32 %v482_v15, %v185_v13 }
 0x434   :  { %v1695_v18 = vpop.f32.mrf.mxu1 }
 0x435   :  { %2012 = vtanh.f32 %v488_v16 }
 0x436   :  { %v485_v20 = vpop.f32.mrf.mxu1 }
 0x438   :  { %v1696_v21 = vpop.f32.mrf.mxu1 }
 0x442   :  { %v2013_v22 = vpop.eup %2012 }
 0x443   :  { %v493_v24 = vpack.c.bf16 %v2013_v22, %v2013_v22 }
 0x445   :  { %1714 = vmatmul.mubr.bf16.vlgmr.msra.gmra.mxu0 %v493_v24 }
 0x446   :  { %1738 = vmatpush3.bf16.msra.mxu0 %v2088_v2  ;;  %1753 = vmatprep.mubr.msk.bf16.mxu0 %vm2037_vm0, %v2036_v0  ;;  %v1980_v2 = vld [vmem:[%s2638_s2 + $0x38] sm:$0xff]  }
 0x447   :  { %1739 = vmatprep.subr.bf16.mxu0 %v2036_v0  ;;  %1757 = vmatprep.subr.bf16.mxu1 %v1980_v2 }
 0x44a   :  { %1740 = vmatpush3.bf16.msra.mxu0 %v2097_v4  ;;  %v186_v4 = vadd.f32 %v2227_v32, %v2258_v46  ;;  %v2431_v46 = vld [vmem:[%s2635_s3 + $0x40] sm:$0xff]  }
 0x44b   :  { %1741 = vmatprep.subr.bf16.mxu0 %v2036_v0 }
 0x44e   :  { %1742 = vmatpush3.bf16.msra.mxu0 %v2107_v6 }
 0x44f   :  { %1743 = vmatprep.subr.bf16.mxu0 %v2036_v0 }
 0x452   :  { %1744 = vmatpush3.bf16.msra.mxu0 %v2117_v8 }
 0x453   :  { %1745 = vmatprep.subr.bf16.mxu0 %v2036_v0 }
 0x456   :  { %1746 = vmatpush3.bf16.msra.mxu0 %v2127_v10 }
 0x457   :  { %1747 = vmatprep.subr.bf16.mxu0 %v2036_v0 }
 0x45a   :  { %1748 = vmatpush3.bf16.msra.mxu0 %v2142_v14 }
 0x45b   :  { %1749 = vmatprep.subr.bf16.mxu0 %v2036_v0 }
 0x45e   :  { %1750 = vmatpush3.bf16.msra.mxu0 %v2153_v17 }
 0x45f   :  { %1751 = vmatprep.subr.bf16.mxu0 %v2036_v0 }
 0x462   :  { %1752 = vmatpush3.bf16.msra.mxu0 %v2163_v19  ;;  %v1981_v19 = vld [vmem:[%s2638_s2 + $0x30] sm:$0xff]  }
 0x463   :  { %1781 = vmatprep.subr.bf16.mxu0 %v2036_v0 }
 0x505   :  { %v528_v6 = vpop.f32.mrf.mxu0 }
 0x506   :  { %v534_v8 = vadd.f32 %v528_v6, %v186_v4 }
 0x507   :  { %v1715_v10 = vpop.f32.mrf.mxu0 }
 0x508   :  { %2014 = vtanh.f32 %v534_v8 }
 0x509   :  { %v531_v14 = vpop.f32.mrf.mxu0 }
 0x50b   :  { %v1716_v17 = vpop.f32.mrf.mxu0 }
 0x515   :  { %v2015_v25 = vpop.eup %2014 }
 0x516   :  { %v539_v26 = vpack.c.bf16 %v2015_v25, %v2015_v25  ;;  %v640_v36 = vpack.c.bf16 %v2015_v25, %v2013_v22 }
 0x518   :  { %1734 = vmatmul.mubr.bf16.vlgmr.msra.gmra.mxu1 %v539_v26 }
 0x519   :  { %1758 = vmatpush3.bf16.msra.mxu1 %v1980_v2  ;;  %1773 = vmatprep.mubr.bf16.mxu1 %v638_v27 }
 0x51a   :  { %1759 = vmatprep.subr.bf16.mxu1 %v1981_v19 }
 0x51d   :  { %1760 = vmatpush3.bf16.msra.mxu1 %v1981_v19 }
 0x51e   :  { %1761 = vmatprep.subr.bf16.mxu1 %v1982_v28 }
 0x521   :  { %1762 = vmatpush3.bf16.msra.mxu1 %v1982_v28 }
 0x522   :  { %1763 = vmatprep.subr.bf16.mxu1 %v1983_v29 }
 0x525   :  { %1764 = vmatpush3.bf16.msra.mxu1 %v1983_v29 }
 0x526   :  { %1765 = vmatprep.subr.bf16.mxu1 %v1984_v30 }
 0x529   :  { %1766 = vmatpush3.bf16.msra.mxu1 %v1984_v30 }
 0x52a   :  { %1767 = vmatprep.subr.bf16.mxu1 %v1985_v31 }
 0x52d   :  { %1768 = vmatpush3.bf16.msra.mxu1 %v1985_v31 }
 0x52e   :  { %1769 = vmatprep.subr.bf16.mxu1 %v1986_v33 }
 0x531   :  { %1770 = vmatpush3.bf16.msra.mxu1 %v1986_v33 }
 0x532   :  { %1771 = vmatprep.subr.bf16.mxu1 %v1987_v34 }
 0x535   :  { %1772 = vmatpush3.bf16.msra.mxu1 %v1987_v34 }
 0x536   :  { %1801 = vmatprep.subr.bf16.mxu1 %v2036_v0 }
 0x538   :  { %1774 = vmatmul.mubr.bf16.vlgmr.msra.gmra.mxu1 %v639_v35 }
 0x539   :  { %1777 = vmatprep.mubr.bf16.mxu1 %v640_v36  ;;  %1802 = vmatpush3.bf16.msra.mxu1 %v2382_v37 }
 0x53a   :  { %1803 = vmatprep.subr.bf16.mxu1 %v2036_v0 }
 0x53d   :  { %1804 = vmatpush3.bf16.msra.mxu1 %v2389_v38 }
 0x53e   :  { %1805 = vmatprep.subr.bf16.mxu1 %v2036_v0 }
 0x541   :  { %1806 = vmatpush3.bf16.msra.mxu1 %v2396_v39 }
 0x542   :  { %1807 = vmatprep.subr.bf16.mxu1 %v2036_v0 }
 0x545   :  { %1808 = vmatpush3.bf16.msra.mxu1 %v2403_v40 }
 0x546   :  { %1809 = vmatprep.subr.bf16.mxu1 %v2036_v0 }
 0x549   :  { %1810 = vmatpush3.bf16.msra.mxu1 %v2410_v41 }
 0x54a   :  { %1811 = vmatprep.subr.bf16.mxu1 %v2036_v0 }
 0x54d   :  { %1812 = vmatpush3.bf16.msra.mxu1 %v2417_v42 }
 0x54e   :  { %1813 = vmatprep.subr.bf16.mxu1 %v2036_v0 }
 0x551   :  { %1814 = vmatpush3.bf16.msra.mxu1 %v2424_v44 }
 0x552   :  { %1815 = vmatprep.subr.bf16.mxu1 %v2036_v0 }
 0x555   :  { %1816 = vmatpush3.bf16.msra.mxu1 %v2431_v46 }
 0x556   :  { %1841 = vmatprep.subr.bf16.mxu1 %v2036_v0 }
 0x5d8   :  { %v574_v48 = vpop.f32.mrf.mxu1 }
 0x5d9   :  { %v580_v49 = vadd.f32 %v574_v48, %v187_v47 }
 0x5da   :  { %v1735_v50 = vpop.f32.mrf.mxu1 }
 0x5db   :  { %2016 = vtanh.f32 %v580_v49 }
 0x5dc   :  { %v577_v51 = vpop.f32.mrf.mxu1 }
 0x5de   :  { %v1736_v52 = vpop.f32.mrf.mxu1 }
 0x5e8   :  { %v2017_v53 = vpop.eup %2016 }
 0x5e9   :  { %v585_v54 = vpack.c.bf16 %v2017_v53, %v2017_v53 }
 0x5eb   :  { %1754 = vmatmul.mubr.bf16.vlgmr.msra.gmra.mxu0 %v585_v54 }
 0x5ec   :  { %1782 = vmatpush3.bf16.msra.mxu0 %v2382_v37  ;;  %1797 = vmatprep.mubr.msk.bf16.mxu0 %vm2037_vm0, %v2036_v0 }
 0x5ed   :  { %1783 = vmatprep.subr.bf16.mxu0 %v2036_v0 }
 0x5f0   :  { %1784 = vmatpush3.bf16.msra.mxu0 %v2389_v38 }
 0x5f1   :  { %1785 = vmatprep.subr.bf16.mxu0 %v2036_v0 }
 0x5f4   :  { %1786 = vmatpush3.bf16.msra.mxu0 %v2396_v39 }
 0x5f5   :  { %1787 = vmatprep.subr.bf16.mxu0 %v2036_v0 }
 0x5f8   :  { %1788 = vmatpush3.bf16.msra.mxu0 %v2403_v40  ;;  %v2478_v61 = vpop.f32.mrf.mxu1 }
 0x5f9   :  { %1789 = vmatprep.subr.bf16.mxu0 %v2036_v0  ;;  %v781_v14 = vadd.f32 %v2478_v61, %v2483_v63 }
 0x5fa   :  { %v740_v62 = vpop.f32.mrf.mxu1 }
 0x5fc   :  { %1790 = vmatpush3.bf16.msra.mxu0 %v2410_v41  ;;  %v1776_v12 = vpop.f32.mrf.mxu1 }
 0x5fd   :  { %1791 = vmatprep.subr.bf16.mxu0 %v2036_v0  ;;  %v782_v30 = vadd.f32 %v1776_v12, %v2483_v63 }
 0x5fe   :  { %v743_v13 = vpop.f32.mrf.mxu1 }
 0x5ff   :  { %v780_v21 = vadd.f32 %v2483_v63, %v743_v13 }
 0x600   :  { %1792 = vmatpush3.bf16.msra.mxu0 %v2417_v42 }
 0x601   :  { %1793 = vmatprep.subr.bf16.mxu0 %v2036_v0 }
 0x604   :  { %1794 = vmatpush3.bf16.msra.mxu0 %v2424_v44 }
 0x605   :  { %1795 = vmatprep.subr.bf16.mxu0 %v2036_v0 }
 0x608   :  { %1796 = vmatpush3.bf16.msra.mxu0 %v2431_v46 }
 0x609   :  { %1821 = vmatprep.subr.bf16.mxu0 %v2036_v0 }
 0x60b   :  { %1798 = vmatmul.mubr.bf16.vlgmr.msra.gmra.mxu0 %v2038_v23  ;;  %v188_v23 = vadd.f32 %v2256_v45, %v2227_v32  ;;  %v779_v32 = vadd.f32 %v2483_v63, %v740_v62 }
 0x60c   :  { %1822 = vmatpush3.bf16.msra.mxu0 %v2382_v37  ;;  %1837 = vmatprep.mubr.msk.bf16.mxu0 %vm2037_vm0, %v2036_v0 }
 0x60d   :  { %1823 = vmatprep.subr.bf16.mxu0 %v2036_v0 }
 0x610   :  { %1824 = vmatpush3.bf16.msra.mxu0 %v2389_v38 }
 0x611   :  { %1825 = vmatprep.subr.bf16.mxu0 %v2036_v0 }
 0x614   :  { %1826 = vmatpush3.bf16.msra.mxu0 %v2396_v39 }
 0x615   :  { %1827 = vmatprep.subr.bf16.mxu0 %v2036_v0 }
 0x618   :  { %1828 = vmatpush3.bf16.msra.mxu0 %v2403_v40 }
 0x619   :  { %1829 = vmatprep.subr.bf16.mxu0 %v2036_v0 }
 0x61c   :  { %1830 = vmatpush3.bf16.msra.mxu0 %v2410_v41 }
 0x61d   :  { %1831 = vmatprep.subr.bf16.mxu0 %v2036_v0 }
 0x620   :  { %1832 = vmatpush3.bf16.msra.mxu0 %v2417_v42 }
 0x621   :  { %1833 = vmatprep.subr.bf16.mxu0 %v2036_v0 }
 0x624   :  { %1834 = vmatpush3.bf16.msra.mxu0 %v2424_v44 }
 0x625   :  { %1835 = vmatprep.subr.bf16.mxu0 %v2036_v0 }
 0x628   :  { %1836 = vmatpush3.bf16.msra.mxu0 %v2431_v46 }
 0x629   :  { %1861 = vmatprep.subr.bf16.mxu0 %v2036_v0 }
 0x6ab   :  { %v620_v43 = vpop.f32.mrf.mxu0 }
 0x6ac   :  { %v626_v55 = vadd.f32 %v620_v43, %v188_v23 }
 0x6ad   :  { %v1755_v56 = vpop.f32.mrf.mxu0 }
 0x6ae   :  { %2018 = vtanh.f32 %v626_v55 }
 0x6af   :  { %v623_v57 = vpop.f32.mrf.mxu0 }
 0x6b1   :  { %v1756_v58 = vpop.f32.mrf.mxu0 }
 0x6bb   :  { %v2019_v59 = vpop.eup %2018 }
 0x6bc   :  { %v641_v60 = vpack.c.bf16 %v2019_v59, %v2017_v53 }
 0x6be   :  { %1778 = vmatmul.mubr.bf16.gmra.mxu1 %v641_v60 }
 0x6bf   :  { %1817 = vmatprep.mubr.msk.bf16.mxu1 %vm2037_vm0, %v2036_v0 }
 0x6cb   :  { %v898_v45 = vpop.f32.mrf.mxu0 }
 0x6cc   :  { %v904_v1 = vadd.f32 %v898_v45, %v779_v32 }
 0x6cd   :  { %v1799_v3 = vpop.f32.mrf.mxu0 }
 0x6ce   :  { %2020 = vtanh.f32 %v904_v1  ;;  %v1999_v3 = vld [vmem:[%s2639_s5 + $0x20] sm:$0xff]  }
 0x6cf   :  { %v901_v5 = vpop.f32.mrf.mxu0 }
 0x6d0   :  { %v2000_v5 = vld [vmem:[%s2639_s5 + $0x18] sm:$0xff]  }
 0x6d1   :  { %v1800_v7 = vpop.f32.mrf.mxu0 }
 0x6d2   :  { %v2001_v7 = vld [vmem:[%s2639_s5 + $0x10] sm:$0xff]  }
 0x6db   :  { %v2021_v9 = vpop.eup %2020 }
 0x6dc   :  { %v907_v11 = vpack.c.bf16 %v2021_v9, %v2021_v9  ;;  %v2002_v9 = vld [vmem:[%s2639_s5 + $0x8] sm:$0xff]  }
 0x6de   :  { %1818 = vmatmul.mubr.bf16.vlgmr.msra.gmra.mxu1 %v907_v11  ;;  %v2003_v11 = vld [vmem:[%s2639_s5] sm:$0xff]  }
 0x6df   :  { %1842 = vmatpush3.bf16.msra.mxu1 %v2382_v37  ;;  %1857 = vmatprep.mubr.msk.bf16.mxu1 %vm2037_vm0, %v2036_v0 }
 0x6e0   :  { %1843 = vmatprep.subr.bf16.mxu1 %v2036_v0 }
 0x6e3   :  { %1844 = vmatpush3.bf16.msra.mxu1 %v2389_v38 }
 0x6e4   :  { %1845 = vmatprep.subr.bf16.mxu1 %v2036_v0 }
 0x6e7   :  { %1846 = vmatpush3.bf16.msra.mxu1 %v2396_v39 }
 0x6e8   :  { %1847 = vmatprep.subr.bf16.mxu1 %v2036_v0 }
 0x6eb   :  { %1848 = vmatpush3.bf16.msra.mxu1 %v2403_v40 }
 0x6ec   :  { %1849 = vmatprep.subr.bf16.mxu1 %v2036_v0 }
 0x6ef   :  { %1850 = vmatpush3.bf16.msra.mxu1 %v2410_v41 }
 0x6f0   :  { %1851 = vmatprep.subr.bf16.mxu1 %v2036_v0 }
 0x6f3   :  { %1852 = vmatpush3.bf16.msra.mxu1 %v2417_v42 }
 0x6f4   :  { %1853 = vmatprep.subr.bf16.mxu1 %v2036_v0 }
 0x6f7   :  { %1854 = vmatpush3.bf16.msra.mxu1 %v2424_v44 }
 0x6f8   :  { %1855 = vmatprep.subr.bf16.mxu1 %v2036_v0 }
 0x6fb   :  { %1856 = vmatpush3.bf16.msra.mxu1 %v2431_v46 }
 0x6fc   :  { %1881 = vmatprep.subr.bf16.mxu1 %v2036_v0 }
 0x77e   :  { %v2504_v15 = vpop.f32.mrf.mxu1 }
 0x77f   :  { %v785_v58 = vadd.f32 %v2504_v15, %v2483_v63 }
 0x780   :  { %v2506_v16 = vpop.f32.mrf.mxu1 }
 0x781   :  { %v783_v49 = vadd.f32 %v2483_v63, %v2506_v16 }
 0x782   :  { %v2508_v18 = vpop.f32.mrf.mxu1 }
 0x783   :  { %v786_v12 = vadd.f32 %v2508_v18, %v2483_v63 }
 0x784   :  { %v2510_v20 = vpop.f32.mrf.mxu1 }
 0x79e   :  { %v942_v22 = vpop.f32.mrf.mxu1 }
 0x79f   :  { %v948_v24 = vadd.f32 %v942_v22, %v780_v21 }
 0x7a0   :  { %v1819_v2 = vpop.f32.mrf.mxu1 }
 0x7a1   :  { %2022 = vtanh.f32 %v948_v24 }
 0x7a2   :  { %v945_v4 = vpop.f32.mrf.mxu1 }
 0x7a4   :  { %v1820_v6 = vpop.f32.mrf.mxu1 }
 0x7ae   :  { %v2023_v8 = vpop.eup %2022 }
 0x7af   :  { %v951_v10 = vpack.c.bf16 %v2023_v8, %v2023_v8 }
 0x7b1   :  { %1838 = vmatmul.mubr.bf16.vlgmr.msra.gmra.mxu0 %v951_v10 }
 0x7b2   :  { %1862 = vmatpush3.bf16.msra.mxu0 %v2382_v37  ;;  %1877 = vmatprep.mubr.msk.bf16.mxu0 %vm2037_vm0, %v2036_v0 }
 0x7b3   :  { %1863 = vmatprep.subr.bf16.mxu0 %v2036_v0 }
 0x7b6   :  { %1864 = vmatpush3.bf16.msra.mxu0 %v2389_v38 }
 0x7b7   :  { %1865 = vmatprep.subr.bf16.mxu0 %v2036_v0 }
 0x7ba   :  { %1866 = vmatpush3.bf16.msra.mxu0 %v2396_v39 }
 0x7bb   :  { %1867 = vmatprep.subr.bf16.mxu0 %v2036_v0 }
 0x7be   :  { %1868 = vmatpush3.bf16.msra.mxu0 %v2403_v40 }
 0x7bf   :  { %1869 = vmatprep.subr.bf16.mxu0 %v2036_v0 }
 0x7c2   :  { %1870 = vmatpush3.bf16.msra.mxu0 %v2410_v41 }
 0x7c3   :  { %1871 = vmatprep.subr.bf16.mxu0 %v2036_v0 }
 0x7c6   :  { %1872 = vmatpush3.bf16.msra.mxu0 %v2417_v42 }
 0x7c7   :  { %1873 = vmatprep.subr.bf16.mxu0 %v2036_v0 }
 0x7ca   :  { %1874 = vmatpush3.bf16.msra.mxu0 %v2424_v44 }
 0x7cb   :  { %1875 = vmatprep.subr.bf16.mxu0 %v2036_v0 }
 0x7ce   :  { %1876 = vmatpush3.bf16.msra.mxu0 %v2431_v46 }
 0x7cf   :  { %1901 = vmatprep.subr.bf16.mxu0 %v2036_v0 }
 0x871   :  { %v986_v17 = vpop.f32.mrf.mxu0 }
 0x872   :  { %v992_v25 = vadd.f32 %v986_v17, %v781_v14 }
 0x873   :  { %v1839_v26 = vpop.f32.mrf.mxu0 }
 0x874   :  { %2024 = vtanh.f32 %v992_v25 }
 0x875   :  { %v989_v19 = vpop.f32.mrf.mxu0 }
 0x877   :  { %v1840_v27 = vpop.f32.mrf.mxu0 }
 0x881   :  { %v2025_v28 = vpop.eup %2024 }
 0x882   :  { %v995_v29 = vpack.c.bf16 %v2025_v28, %v2025_v28 }
 0x884   :  { %1858 = vmatmul.mubr.bf16.vlgmr.msra.gmra.mxu1 %v995_v29 }
 0x885   :  { %1882 = vmatpush3.bf16.msra.mxu1 %v2382_v37  ;;  %1897 = vmatprep.mubr.msk.bf16.mxu1 %vm2037_vm0, %v2036_v0 }
 0x886   :  { %1883 = vmatprep.subr.bf16.mxu1 %v2036_v0 }
 0x889   :  { %1884 = vmatpush3.bf16.msra.mxu1 %v2389_v38 }
 0x88a   :  { %1885 = vmatprep.subr.bf16.mxu1 %v2036_v0 }
 0x88d   :  { %1886 = vmatpush3.bf16.msra.mxu1 %v2396_v39 }
 0x88e   :  { %1887 = vmatprep.subr.bf16.mxu1 %v2036_v0 }
 0x891   :  { %1888 = vmatpush3.bf16.msra.mxu1 %v2403_v40 }
 0x892   :  { %1889 = vmatprep.subr.bf16.mxu1 %v2036_v0 }
 0x895   :  { %1890 = vmatpush3.bf16.msra.mxu1 %v2410_v41 }
 0x896   :  { %1891 = vmatprep.subr.bf16.mxu1 %v2036_v0 }
 0x899   :  { %1892 = vmatpush3.bf16.msra.mxu1 %v2417_v42 }
 0x89a   :  { %1893 = vmatprep.subr.bf16.mxu1 %v2036_v0 }
 0x89d   :  { %1894 = vmatpush3.bf16.msra.mxu1 %v2424_v44 }
 0x89e   :  { %1895 = vmatprep.subr.bf16.mxu1 %v2036_v0 }
 0x8a1   :  { %1896 = vmatpush3.bf16.msra.mxu1 %v2431_v46 }
 0x8a2   :  { %1921 = vmatprep.subr.bf16.mxu1 %v2036_v0 }
 0x944   :  { %v1030_v31 = vpop.f32.mrf.mxu1 }
 0x945   :  { %v1036_v33 = vadd.f32 %v1030_v31, %v782_v30 }
 0x946   :  { %v1859_v34 = vpop.f32.mrf.mxu1 }
 0x947   :  { %2026 = vtanh.f32 %v1036_v33 }
 0x948   :  { %v1033_v35 = vpop.f32.mrf.mxu1 }
 0x94a   :  { %v1860_v36 = vpop.f32.mrf.mxu1 }
 0x954   :  { %v2027_v47 = vpop.eup %2026 }
 0x955   :  { %v1039_v48 = vpack.c.bf16 %v2027_v47, %v2027_v47 }
 0x957   :  { %1878 = vmatmul.mubr.bf16.vlgmr.msra.gmra.mxu0 %v1039_v48 }
 0x958   :  { %1902 = vmatpush3.bf16.msra.mxu0 %v2382_v37  ;;  %1917 = vmatprep.mubr.msk.bf16.mxu0 %vm2037_vm0, %v2036_v0 }
 0x959   :  { %1903 = vmatprep.subr.bf16.mxu0 %v2036_v0 }
 0x95c   :  { %1904 = vmatpush3.bf16.msra.mxu0 %v2389_v38 }
 0x95d   :  { %1905 = vmatprep.subr.bf16.mxu0 %v2036_v0 }
 0x960   :  { %1906 = vmatpush3.bf16.msra.mxu0 %v2396_v39 }
 0x961   :  { %1907 = vmatprep.subr.bf16.mxu0 %v2036_v0 }
 0x964   :  { %1908 = vmatpush3.bf16.msra.mxu0 %v2403_v40 }
 0x965   :  { %1909 = vmatprep.subr.bf16.mxu0 %v2036_v0 }
 0x968   :  { %1910 = vmatpush3.bf16.msra.mxu0 %v2410_v41 }
 0x969   :  { %1911 = vmatprep.subr.bf16.mxu0 %v2036_v0 }
 0x96c   :  { %1912 = vmatpush3.bf16.msra.mxu0 %v2417_v42 }
 0x96d   :  { %1913 = vmatprep.subr.bf16.mxu0 %v2036_v0 }
 0x970   :  { %1914 = vmatpush3.bf16.msra.mxu0 %v2424_v44 }
 0x971   :  { %1915 = vmatprep.subr.bf16.mxu0 %v2036_v0 }
 0x974   :  { %1916 = vmatpush3.bf16.msra.mxu0 %v2431_v46 }
 0x975   :  { %1941 = vmatprep.subr.bf16.mxu0 %v2036_v0 }
 0xa17   :  { %v1074_v50 = vpop.f32.mrf.mxu0 }
 0xa18   :  { %v1080_v51 = vadd.f32 %v1074_v50, %v783_v49 }
 0xa19   :  { %v1879_v52 = vpop.f32.mrf.mxu0 }
 0xa1a   :  { %2028 = vtanh.f32 %v1080_v51 }
 0xa1b   :  { %v1077_v53 = vpop.f32.mrf.mxu0 }
 0xa1d   :  { %v1880_v54 = vpop.f32.mrf.mxu0 }
 0xa27   :  { %v2029_v23 = vpop.eup %2028 }
 0xa28   :  { %v1083_v43 = vpack.c.bf16 %v2029_v23, %v2029_v23 }
 0xa2a   :  { %1898 = vmatmul.mubr.bf16.vlgmr.msra.gmra.mxu1 %v1083_v43 }
 0xa2b   :  { %1922 = vmatpush3.bf16.msra.mxu1 %v2382_v37  ;;  %1937 = vmatprep.mubr.msk.bf16.mxu1 %vm2037_vm0, %v2036_v0  ;;  %v784_v37 = vadd.f32 %v2483_v63, %v2510_v20 }
 0xa2c   :  { %1923 = vmatprep.subr.bf16.mxu1 %v2036_v0 }
 0xa2f   :  { %1924 = vmatpush3.bf16.msra.mxu1 %v2389_v38 }
 0xa30   :  { %1925 = vmatprep.subr.bf16.mxu1 %v2036_v0 }
 0xa33   :  { %1926 = vmatpush3.bf16.msra.mxu1 %v2396_v39 }
 0xa34   :  { %1927 = vmatprep.subr.bf16.mxu1 %v2036_v0 }
 0xa37   :  { %1928 = vmatpush3.bf16.msra.mxu1 %v2403_v40 }
 0xa38   :  { %1929 = vmatprep.subr.bf16.mxu1 %v2036_v0 }
 0xa3b   :  { %1930 = vmatpush3.bf16.msra.mxu1 %v2410_v41 }
 0xa3c   :  { %1931 = vmatprep.subr.bf16.mxu1 %v2036_v0 }
 0xa3f   :  { %1932 = vmatpush3.bf16.msra.mxu1 %v2417_v42  ;;  %v1996_v42 = vld [vmem:[%s2639_s5 + $0x38] sm:$0xff]  }
 0xa40   :  { %1933 = vmatprep.subr.bf16.mxu1 %v2036_v0 }
 0xa43   :  { %1934 = vmatpush3.bf16.msra.mxu1 %v2424_v44  ;;  %v1997_v44 = vld [vmem:[%s2639_s5 + $0x30] sm:$0xff]  }
 0xa44   :  { %1935 = vmatprep.subr.bf16.mxu1 %v2036_v0 }
 0xa47   :  { %1936 = vmatpush3.bf16.msra.mxu1 %v2431_v46  ;;  %v1998_v46 = vld [vmem:[%s2639_s5 + $0x28] sm:$0xff]  }
 0xaea   :  { %v1118_v38 = vpop.f32.mrf.mxu1 }
 0xaeb   :  { %v1124_v39 = vadd.f32 %v1118_v38, %v784_v37 }
 0xaec   :  { %v1899_v40 = vpop.f32.mrf.mxu1 }
 0xaed   :  { %2030 = vtanh.f32 %v1124_v39 }
 0xaee   :  { %v1121_v41 = vpop.f32.mrf.mxu1 }
 0xaf0   :  { %v1900_v55 = vpop.f32.mrf.mxu1 }
 0xafa   :  { %v2031_v56 = vpop.eup %2030 }
 0xafb   :  { %v1127_v57 = vpack.c.bf16 %v2031_v56, %v2031_v56 }
 0xafd   :  { %1918 = vmatmul.mubr.bf16.vlgmr.msra.gmra.mxu0 %v1127_v57 }
 0xafe   :  { %1957 = vmatprep.mubr.msk.bf16.mxu0 %vm2037_vm0, %v2036_v0  ;;  %1942 = vmatpush3.bf16.msra.mxu0 %v1996_v42 }
 0xaff   :  { %1943 = vmatprep.subr.bf16.mxu0 %v2036_v0 }
 0xb02   :  { %1944 = vmatpush3.bf16.msra.mxu0 %v1997_v44 }
 0xb03   :  { %1945 = vmatprep.subr.bf16.mxu0 %v2036_v0 }
 0xb06   :  { %1946 = vmatpush3.bf16.msra.mxu0 %v1998_v46 }
 0xb07   :  { %1947 = vmatprep.subr.bf16.mxu0 %v2036_v0 }
 0xb0a   :  { %1948 = vmatpush3.bf16.msra.mxu0 %v1999_v3 }
 0xb0b   :  { %1949 = vmatprep.subr.bf16.mxu0 %v2036_v0 }
 0xb0e   :  { %1950 = vmatpush3.bf16.msra.mxu0 %v2000_v5 }
 0xb0f   :  { %1951 = vmatprep.subr.bf16.mxu0 %v2036_v0 }
 0xb12   :  { %1952 = vmatpush3.bf16.msra.mxu0 %v2001_v7 }
 0xb13   :  { %1953 = vmatprep.subr.bf16.mxu0 %v2036_v0 }
 0xb16   :  { %1954 = vmatpush3.bf16.msra.mxu0 %v2002_v9 }
 0xb17   :  { %1955 = vmatprep.subr.bf16.mxu0 %v2036_v0  ;;  %v1387_v0 = vld [vmem:[%s2640_s6] ss:$0 sm:$0xff] }
 0xb1a   :  { %1956 = vmatpush3.bf16.msra.mxu0 %v2003_v11 }
 0xbbd   :  { %v1162_v59 = vpop.f32.mrf.mxu0 }
 0xbbe   :  { %v1168_v60 = vadd.f32 %v1162_v59, %v785_v58 }
 0xbbf   :  { %v1919_v61 = vpop.f32.mrf.mxu0 }
 0xbc0   :  { %2032 = vtanh.f32 %v1168_v60 }
 0xbc1   :  { %v1165_v62 = vpop.f32.mrf.mxu0 }
 0xbc3   :  { %v1920_v32 = vpop.f32.mrf.mxu0 }
 0xbcd   :  { %v2033_v45 = vpop.eup %2032 }
 0xbce   :  { %v1171_v1 = vpack.c.bf16 %v2033_v45, %v2033_v45 }
 0xbd0   :  { %1938 = vmatmul.mubr.bf16.vlgmr.msra.gmra.mxu1 %v1171_v1 }
 0xc90   :  { %v1206_v13 = vpop.f32.mrf.mxu1 }
 0xc91   :  { %v1212_v15 = vadd.f32 %v1206_v13, %v786_v12 }
 0xc92   :  { %v1939_v16 = vpop.f32.mrf.mxu1 }
 0xc93   :  { %2034 = vtanh.f32 %v1212_v15 }
 0xc94   :  { %v1209_v20 = vpop.f32.mrf.mxu1 }
 0xc96   :  { %v1940_v21 = vpop.f32.mrf.mxu1 }
 0xca0   :  { %v2035_v22 = vpop.eup %2034 }
 0xca1   :  { %v1219_v24 = vpack.c.bf16 %v2035_v22, %v2035_v22 }
 0xca3   :  { %1958 = vmatmul.mubr.bf16.vlgmr.msra.gmra.mxu0 %v1219_v24 }
 0xd63   :  { %v1325_v2 = vpop.f32.mrf.mxu0 }
 0xd64   :  { %v1326_v4 = vadd.f32 %v1387_v0, %v1325_v2 }
 0xd65   :  { %v1959_v6 = vpop.f32.mrf.mxu0 }
 0xd66   :  { %1331 = vst [vmem:[%s2641_s7] sm:$0xff] %v1326_v4 }
 0xd67   :  { %v1328_v63 = vpop.f32.mrf.mxu0 }
 0xd69   :  { %v1960_v18 = vpop.f32.mrf.mxu0 }

</bundles_post_ra>
